<compile_context>
chip_gen: v6e
topology: v6e:2x2x1
jax: 0.10.0
libtpu: 0.0.40
codegen_flags: <defaults>
</compile_context>

<pallas_src>
import functools

import jax
import jax.numpy as jnp
from jax import lax
from jax.experimental import pallas as pl
from jax.experimental.pallas import tpu as pltpu

_BF16 = jnp.bfloat16
_F32 = jnp.float32
_VMEM_LIMIT = 48 * 1024 * 1024   # safe on v5e/v6e (128 MiB) and v7x (64 MiB physical)


def _round_up(x, m):
    return (x + m - 1) // m * m


def _largest_divisor_le(n, target):
    target = max(1, min(n, target))
    for d in range(target, 0, -1):
        if n % d == 0:
            return d
    return 1


def _pick_row_tile(m, block_m, min_steps=8):
    """Row tile: multiple of 8, <= block_m, aiming for >= min_steps grid steps
    (so v7x's two TensorCores each see several pipelined steps)."""
    tm = min(block_m, _round_up(m, 8))
    tm = min(tm, max(8, _round_up(pl.cdiv(m, min_steps), 8)))
    return max(8, tm)


# ----------------------------- Pallas kernel bodies -----------------------------

def _mm_bn_kernel(x_ref, w_ref, scale_ref, shift_ref, o_ref, *, relu):
    """out = act((x @ w) * scale + shift); f32 MXU accumulation."""
    y = jnp.dot(x_ref[...], w_ref[...], preferred_element_type=jnp.float32)
    y = y * scale_ref[...] + shift_ref[...]
    if relu:
        y = jnp.maximum(y, 0.0)
    o_ref[...] = y.astype(o_ref.dtype)


def _mm_bn_add_relu_kernel(x_ref, w_ref, scale_ref, shift_ref, res_ref, o_ref):
    """Bottleneck tail: out = relu((x @ w) * scale + shift + residual)."""
    y = jnp.dot(x_ref[...], w_ref[...], preferred_element_type=jnp.float32)
    y = y * scale_ref[...] + shift_ref[...]
    y = y + res_ref[...].astype(jnp.float32)
    o_ref[...] = jnp.maximum(y, 0.0).astype(o_ref.dtype)


def _mm_bn_dual_kernel(x_ref, w1_ref, s1_ref, b1_ref, w2_ref, s2_ref, b2_ref,
                       o1_ref, o2_ref):
    """One HBM read of x feeding two 1x1-conv+BN matmuls, two lane-dense outputs:
    o1 = relu(x@w1 * s1 + b1)  (conv1 path);   o2 = x@w2 * s2 + b2 (shortcut path)."""
    x = x_ref[...]
    y1 = jnp.dot(x, w1_ref[...], preferred_element_type=jnp.float32)
    y1 = y1 * s1_ref[...] + b1_ref[...]
    o1_ref[...] = jnp.maximum(y1, 0.0).astype(o1_ref.dtype)
    y2 = jnp.dot(x, w2_ref[...], preferred_element_type=jnp.float32)
    y2 = y2 * s2_ref[...] + b2_ref[...]
    o2_ref[...] = y2.astype(o2_ref.dtype)


def _conv3x3_bn_relu_kernel(xph_ref, w_ref, scale_ref, shift_ref, o_ref,
                            *, k, s, th, wo, cin):
    """k x k conv (stride s) for one row block of one image, + folded BN + ReLU.

    xph_ref : (s*s, Hph, Wph, Cin)  stride-phase decomposition of the zero-padded
              image (identity layout for s == 1), resident across row blocks.
    w_ref   : (k*k*Cin, Cout);  scale/shift: (1, Cout);  o_ref: (th, wo, Cout).

    The k*k tap windows are concatenated along the channel (lane) axis in VMEM so
    the whole accumulation happens inside a single fat MXU matmul (K = k*k*Cin).
    """
    cout = w_ref.shape[-1]
    r0 = pl.program_id(1) * th
    taps = []
    for di in range(k):                       # unrolled; all window reads contiguous in H
        for dj in range(k):
            ph = (di % s) * s + (dj % s)
            taps.append(xph_ref[ph, pl.ds(r0 + di // s, th), pl.ds(dj // s, wo), :])
    patch = jnp.concatenate(taps, axis=-1).reshape(th * wo, k * k * cin)
    y = jnp.dot(patch, w_ref[...], preferred_element_type=jnp.float32)
    y = y * scale_ref[...] + shift_ref[...]
    y = jnp.maximum(y, 0.0)
    o_ref[...] = y.reshape(th, wo, cout).astype(o_ref.dtype)


# --------------------------------- wrappers ---------------------------------

def fused_matmul_bn(x, w, scale, shift, *, relu, residual=None,
                    out_dtype=_BF16, block_m=512):
    """act((x @ w) * scale + shift [+ residual]), row-tiled with a parallel grid.
    No host-side M padding: ragged last block is handled by masked stores."""
    m, kdim = x.shape
    n = w.shape[1]
    x = x.astype(_BF16)
    w = w.astype(_BF16)
    scale = scale.reshape(1, n).astype(_F32)
    shift = shift.reshape(1, n).astype(_F32)

    tm = _pick_row_tile(m, block_m)
    grid = (pl.cdiv(m, tm),)

    args = [x, w, scale, shift]
    in_specs = [
        pl.BlockSpec((tm, kdim), lambda i: (i, 0)),
        # Constant index_map -> weight/scale/shift fetched once and stay resident.
        pl.BlockSpec((kdim, n), lambda i: (0, 0)),
        pl.BlockSpec((1, n), lambda i: (0, 0)),
        pl.BlockSpec((1, n), lambda i: (0, 0)),
    ]
    res_bytes = 0
    if residual is not None:
        residual = residual.astype(_BF16)
        args.append(residual)
        in_specs.append(pl.BlockSpec((tm, n), lambda i: (i, 0)))
        kernel = _mm_bn_add_relu_kernel
        res_bytes = m * n * 2
    else:
        kernel = functools.partial(_mm_bn_kernel, relu=relu)

    out_bytes = m * n * jnp.dtype(out_dtype).itemsize
    return pl.pallas_call(
        kernel,
        out_shape=jax.ShapeDtypeStruct((m, n), out_dtype),
        grid=grid,
        in_specs=in_specs,
        out_specs=pl.BlockSpec((tm, n), lambda i: (i, 0)),
        compiler_params=pltpu.CompilerParams(
            dimension_semantics=("parallel",),
            vmem_limit_bytes=_VMEM_LIMIT),
        cost_estimate=pl.CostEstimate(
            flops=2 * m * kdim * n,
            transcendentals=0,
            bytes_accessed=2 * m * kdim + 2 * kdim * n + 8 * n + res_bytes + out_bytes),
    )(*args)


def fused_matmul_bn_dual(x, w1, scale1, shift1, w2, scale2, shift2, *, block_m=512):
    """conv1+BN1+ReLU and projection-shortcut+BN from a single HBM read of x,
    written to two separate lane-dense outputs (no column slicing afterwards)."""
    m, kdim = x.shape
    n1, n2 = w1.shape[1], w2.shape[1]
    x = x.astype(_BF16)
    w1 = w1.astype(_BF16)
    w2 = w2.astype(_BF16)
    scale1 = scale1.reshape(1, n1).astype(_F32)
    shift1 = shift1.reshape(1, n1).astype(_F32)
    scale2 = scale2.reshape(1, n2).astype(_F32)
    shift2 = shift2.reshape(1, n2).astype(_F32)

    tm = _pick_row_tile(m, block_m)
    grid = (pl.cdiv(m, tm),)
    return pl.pallas_call(
        _mm_bn_dual_kernel,
        out_shape=(jax.ShapeDtypeStruct((m, n1), _BF16),
                   jax.ShapeDtypeStruct((m, n2), _BF16)),
        grid=grid,
        in_specs=[
            pl.BlockSpec((tm, kdim), lambda i: (i, 0)),
            pl.BlockSpec((kdim, n1), lambda i: (0, 0)),
            pl.BlockSpec((1, n1), lambda i: (0, 0)),
            pl.BlockSpec((1, n1), lambda i: (0, 0)),
            pl.BlockSpec((kdim, n2), lambda i: (0, 0)),
            pl.BlockSpec((1, n2), lambda i: (0, 0)),
            pl.BlockSpec((1, n2), lambda i: (0, 0)),
        ],
        out_specs=(pl.BlockSpec((tm, n1), lambda i: (i, 0)),
                   pl.BlockSpec((tm, n2), lambda i: (i, 0))),
        compiler_params=pltpu.CompilerParams(
            dimension_semantics=("parallel",),
            vmem_limit_bytes=_VMEM_LIMIT),
        cost_estimate=pl.CostEstimate(
            flops=2 * m * kdim * (n1 + n2),
            transcendentals=0,
            bytes_accessed=2 * m * kdim + 2 * kdim * (n1 + n2) + 8 * (n1 + n2)
                           + 2 * m * (n1 + n2)),
    )(x, w1, scale1, shift1, w2, scale2, shift2)


def conv3x3_bn_relu(x, w_hwio, scale, shift, *, stride=1, pad=1):
    """3x3 conv (stride, padding=1, no bias) + folded BN + ReLU.  x: (B,H,W,Cin) NHWC.
    Grid = (B, n_row_blocks); the (phased) padded image is fetched once per image and
    stays resident across row blocks; output row blocks are pipelined."""
    b, h, wdim, cin = x.shape
    k = w_hwio.shape[0]
    cout = w_hwio.shape[-1]
    s = stride
    ho = (h + 2 * pad - k) // s + 1
    wo = (wdim + 2 * pad - k) // s + 1
    hp, wp = h + 2 * pad, wdim + 2 * pad

    xpad = jnp.pad(x.astype(_BF16), ((0, 0), (pad, pad), (pad, pad), (0, 0)))
    if s > 1:
        # Stride-phase decomposition (a partition, no duplication) so every in-kernel
        # tap read stays a contiguous window.
        hph, wph = _round_up(hp, s) // s, _round_up(wp, s) // s
        xpad = jnp.pad(xpad, ((0, 0), (0, hph * s - hp), (0, wph * s - wp), (0, 0)))
        phases = xpad.reshape(b, hph, s, wph, s, cin).transpose(0, 2, 4, 1, 3, 5)
        phases = phases.reshape(b, s * s, hph, wph, cin)
    else:
        hph, wph = hp, wp
        phases = xpad.reshape(b, 1, hp, wp, cin)

    # Row tile: >= ~8 row blocks per image for pipeline depth / TC split, while the
    # per-step matmul M (th*wo) stays reasonably fat.  th divides ho -> no ragged reads.
    row_block_target = min(max(1, ho // 8), max(1, 512 // wo))
    th = _largest_divisor_le(ho, row_block_target)
    nrb = ho // th

    wmat = w_hwio.reshape(k * k * cin, cout).astype(_BF16)   # (di, dj, cin) flattened
    scale = scale.reshape(1, cout).astype(_F32)
    shift = shift.reshape(1, cout).astype(_F32)

    kernel = functools.partial(_conv3x3_bn_relu_kernel,
                               k=k, s=s, th=th, wo=wo, cin=cin)
    return pl.pallas_call(
        kernel,
        out_shape=jax.ShapeDtypeStruct((b, ho, wo, cout), _BF16),
        grid=(b, nrb),
        in_specs=[
            pl.BlockSpec((None, s * s, hph, wph, cin),
                         lambda bi, ri: (bi, 0, 0, 0, 0)),       # resident per image
            pl.BlockSpec((k * k * cin, cout), lambda bi, ri: (0, 0)),
            pl.BlockSpec((1, cout), lambda bi, ri: (0, 0)),
            pl.BlockSpec((1, cout), lambda bi, ri: (0, 0)),
        ],
        out_specs=pl.BlockSpec((None, th, wo, cout), lambda bi, ri: (bi, ri, 0, 0)),
        compiler_params=pltpu.CompilerParams(
            dimension_semantics=("parallel", "parallel"),
            vmem_limit_bytes=_VMEM_LIMIT),
        cost_estimate=pl.CostEstimate(
            flops=2 * b * ho * wo * k * k * cin * cout,
            transcendentals=0,
            bytes_accessed=2 * b * s * s * hph * wph * cin
                           + 2 * k * k * cin * cout
                           + 2 * b * ho * wo * cout),
    )(phases, wmat, scale, shift)


# ------------------------------- forward pass -------------------------------

def bottleneck_forward(params, x_nchw, *, stride=1):
    """Bottleneck.forward (eval mode): relu(bn1(conv1)) -> relu(bn2(conv2)) ->
    bn3(conv3) + shortcut(x) -> relu.  Input/Output are NCHW, like PyTorch."""
    p = params
    x = jnp.transpose(x_nchw, (0, 2, 3, 1)).astype(_BF16)      # NCHW -> NHWC
    b, h, w, cin = x.shape
    planes = p['w1'].shape[1]
    cout = p['w3'].shape[1]                                     # planes * expansion
    xf = x.reshape(b * h * w, cin)

    has_proj = 'wsc' in p
    if has_proj and stride == 1:
        # conv1 and the projection shortcut share the same input rows: one kernel,
        # one HBM read of x, two lane-dense outputs.
        out1_f, residual = fused_matmul_bn_dual(
            xf, p['w1'], p['bn1_scale'], p['bn1_shift'],
            p['wsc'], p['bnsc_scale'], p['bnsc_shift'])
        out1 = out1_f.reshape(b, h, w, planes)
    else:
        out1 = fused_matmul_bn(xf, p['w1'], p['bn1_scale'], p['bn1_shift'],
                               relu=True).reshape(b, h, w, planes)
        if has_proj:
            xs = x[:, ::stride, ::stride, :] if stride > 1 else x
            residual = fused_matmul_bn(xs.reshape(-1, cin), p['wsc'],
                                       p['bnsc_scale'], p['bnsc_shift'], relu=False)
        else:
            residual = xf          # identity shortcut (stride == 1 and cin == cout)

    out2 = conv3x3_bn_relu(out1, p['w2'], p['bn2_scale'], p['bn2_shift'], stride=stride)
    _, ho, wo, _ = out2.shape

    # conv3 (1x1) + BN3 + residual add + final ReLU, all fused in one kernel.
    out = fused_matmul_bn(out2.reshape(b * ho * wo, planes), p['w3'],
                          p['bn3_scale'], p['bn3_shift'],
                          relu=False, residual=residual, out_dtype=_F32)
    return jnp.transpose(out.reshape(b, ho, wo, cout), (0, 3, 1, 2))    # -> NCHW


# --------------------------- reference & parameters -------------------------

def _reference_forward(params, x_nchw, stride):
    """Pure-JAX f32 reference matching the PyTorch module (eval-mode BN)."""
    p = params
    x = jnp.transpose(x_nchw, (0, 2, 3, 1)).astype(_F32)

    def conv1x1(h, wmat):
        return jnp.einsum('bhwc,cd->bhwd', h, wmat.astype(_F32))

    h = jax.nn.relu(conv1x1(x, p['w1']) * p['bn1_scale'] + p['bn1_shift'])
    h = lax.conv_general_dilated(h, p['w2'].astype(_F32), (stride, stride),
                                 ((1, 1), (1, 1)),
                                 dimension_numbers=('NHWC', 'HWIO', 'NHWC'))
    h = jax.nn.relu(h * p['bn2_scale'] + p['bn2_shift'])
    h = conv1x1(h, p['w3']) * p['bn3_scale'] + p['bn3_shift']
    if 'wsc' in p:
        xs = x[:, ::stride, ::stride, :]
        r = conv1x1(xs, p['wsc']) * p['bnsc_scale'] + p['bnsc_shift']
    else:
        r = x
    return jnp.transpose(jax.nn.relu(h + r), (0, 3, 1, 2))


def init_bottleneck_params(key, in_planes, planes, stride, expansion=2):
    keys = iter(jax.random.split(key, 24))
    nk = lambda: next(keys)

    def kaiming(shape, fan_in):
        return jax.random.normal(nk(), shape, _F32) * jnp.sqrt(2.0 / fan_in)

    def bn_fold(c, eps=1e-5):
        gamma = 1.0 + 0.1 * jax.random.normal(nk(), (c,), _F32)
        beta = 0.1 * jax.random.normal(nk(), (c,), _F32)
        running_mean = 0.1 * jax.random.normal(nk(), (c,), _F32)
        running_var = 1.0 + 0.1 * jax.random.uniform(nk(), (c,), _F32)
        scale = gamma * lax.rsqrt(running_var + eps)
        shift = beta - running_mean * scale
        return scale, shift

    out_planes = planes * expansion
    p = {}
    p['w1'] = kaiming((in_planes, planes), in_planes)                  # conv1 1x1
    p['bn1_scale'], p['bn1_shift'] = bn_fold(planes)
    p['w2'] = kaiming((3, 3, planes, planes), 9 * planes)              # conv2 3x3 (HWIO)
    p['bn2_scale'], p['bn2_shift'] = bn_fold(planes)
    p['w3'] = kaiming((planes, out_planes), planes)                    # conv3 1x1
    p['bn3_scale'], p['bn3_shift'] = bn_fold(out_planes)
    if stride != 1 or in_planes != out_planes:                         # projection shortcut
        p['wsc'] = kaiming((in_planes, out_planes), in_planes)
        p['bnsc_scale'], p['bnsc_shift'] = bn_fold(out_planes)
    return p


# ----------------------------------- main -----------------------------------

if __name__ == "__main__":
    key = jax.random.PRNGKey(0)
    batch = 2
    configs = [
        # (in_planes, planes, stride, H, W)
        (64, 64, 1, 16, 16),      # projection shortcut, stride 1 (dual-output kernel)
        (128, 64, 1, 16, 16),     # identity shortcut
        (64, 32, 2, 16, 16),      # strided block + projection shortcut
    ]
    for idx, (cin, planes, stride, h, w) in enumerate(configs):
        kx, kp = jax.random.split(jax.random.fold_in(key, idx))
        x = jax.random.normal(kx, (batch, cin, h, w), _F32)
        params = init_bottleneck_params(kp, cin, planes, stride)

        fwd = jax.jit(functools.partial(bottleneck_forward, stride=stride))
        out = jax.block_until_ready(fwd(params, x))

        ref = _reference_forward(params, x, stride)
        assert out.shape == ref.shape, (out.shape, ref.shape)
        assert bool(jnp.all(jnp.isfinite(out)))
        assert bool(jnp.all(out >= 0.0))                               # final ReLU
        err = float(jnp.max(jnp.abs(out - ref)))
        assert bool(jnp.allclose(out, ref, atol=2e-1, rtol=1e-1)), (idx, err)

    print("KERNEL_OK")
</pallas_src>

<mosaic_0001>
module attributes {stable_mosaic.version = 11 : i64} {
  func.func @_mm_bn_dual_kernel(%arg0: i32, %arg1: memref<64x64xbf16, #tpu.memory_space<vmem>>, %arg2: memref<64x64xbf16, #tpu.memory_space<vmem>>, %arg3: memref<1x64xf32, #tpu.memory_space<vmem>>, %arg4: memref<1x64xf32, #tpu.memory_space<vmem>>, %arg5: memref<64x128xbf16, #tpu.memory_space<vmem>>, %arg6: memref<1x128xf32, #tpu.memory_space<vmem>>, %arg7: memref<1x128xf32, #tpu.memory_space<vmem>>, %arg8: memref<64x64xbf16, #tpu.memory_space<vmem>>, %arg9: memref<64x128xbf16, #tpu.memory_space<vmem>>) attributes {dimension_semantics = [#tpu.dimension_semantics<parallel>], iteration_bounds = array<i64: 8>, scalar_prefetch = 0 : i64, scratch_operands = 0 : i64, tpu.core_type = #tpu.core_type<tc>, window_params = [{transform_indices = @transform_0, window_bounds = array<i64: 64, 64>}, {pipeline_mode = #tpu.pipeline_mode<synchronous>, transform_indices = @transform_1, window_bounds = array<i64: 64, 64>}, {pipeline_mode = #tpu.pipeline_mode<synchronous>, transform_indices = @transform_2, window_bounds = array<i64: 1, 64>}, {pipeline_mode = #tpu.pipeline_mode<synchronous>, transform_indices = @transform_3, window_bounds = array<i64: 1, 64>}, {pipeline_mode = #tpu.pipeline_mode<synchronous>, transform_indices = @transform_4, window_bounds = array<i64: 64, 128>}, {pipeline_mode = #tpu.pipeline_mode<synchronous>, transform_indices = @transform_5, window_bounds = array<i64: 1, 128>}, {pipeline_mode = #tpu.pipeline_mode<synchronous>, transform_indices = @transform_6, window_bounds = array<i64: 1, 128>}, {transform_indices = @transform_7, window_bounds = array<i64: 64, 64>}, {transform_indices = @transform_8, window_bounds = array<i64: 64, 128>}]} {
    %c0 = arith.constant 0 : index
    %c0_0 = arith.constant 0 : index
    %0 = vector.load %arg1[%c0, %c0_0] : memref<64x64xbf16, #tpu.memory_space<vmem>>, vector<64x64xbf16>
    %c0_1 = arith.constant 0 : index
    %c0_2 = arith.constant 0 : index
    %1 = vector.load %arg2[%c0_1, %c0_2] : memref<64x64xbf16, #tpu.memory_space<vmem>>, vector<64x64xbf16>
    %cst = arith.constant dense<0.000000e+00> : vector<64x64xf32>
    %2 = tpu.matmul %0, %1, %cst {dimension_numbers = #tpu.dot_dimension_numbers<[1], [0], [0], [1], [0, 0, 1, 1], [], []>} : vector<64x64xbf16>, vector<64x64xbf16>, vector<64x64xf32> -> vector<64x64xf32>
    %c0_3 = arith.constant 0 : index
    %c0_4 = arith.constant 0 : index
    %3 = vector.load %arg3[%c0_3, %c0_4] : memref<1x64xf32, #tpu.memory_space<vmem>>, vector<1x64xf32>
    %4 = vector.broadcast %3 : vector<1x64xf32> to vector<64x64xf32>
    %5 = arith.mulf %2, %4 : vector<64x64xf32>
    %c0_5 = arith.constant 0 : index
    %c0_6 = arith.constant 0 : index
    %6 = vector.load %arg4[%c0_5, %c0_6] : memref<1x64xf32, #tpu.memory_space<vmem>>, vector<1x64xf32>
    %7 = vector.broadcast %6 : vector<1x64xf32> to vector<64x64xf32>
    %8 = arith.addf %5, %7 : vector<64x64xf32>
    %cst_7 = arith.constant 0.000000e+00 : f32
    %9 = vector.broadcast %cst_7 : f32 to vector<64x64xf32>
    %10 = arith.maximumf %8, %9 : vector<64x64xf32>
    %11 = arith.truncf %10 : vector<64x64xf32> to vector<64x64xbf16>
    %c0_8 = arith.constant 0 : index
    %c0_9 = arith.constant 0 : index
    %12 = vector.load %arg8[%c0_8, %c0_9] : memref<64x64xbf16, #tpu.memory_space<vmem>>, vector<64x64xbf16>
    tpu.vector_store %arg8[%c0_8, %c0_9], %11 {strides = array<i32>} : memref<64x64xbf16, #tpu.memory_space<vmem>>, vector<64x64xbf16>,
    %c0_10 = arith.constant 0 : index
    %c0_11 = arith.constant 0 : index
    %13 = vector.load %arg5[%c0_10, %c0_11] : memref<64x128xbf16, #tpu.memory_space<vmem>>, vector<64x128xbf16>
    %cst_12 = arith.constant dense<0.000000e+00> : vector<64x128xf32>
    %14 = tpu.matmul %0, %13, %cst_12 {dimension_numbers = #tpu.dot_dimension_numbers<[1], [0], [0], [1], [0, 0, 1, 1], [], []>} : vector<64x64xbf16>, vector<64x128xbf16>, vector<64x128xf32> -> vector<64x128xf32>
    %c0_13 = arith.constant 0 : index
    %c0_14 = arith.constant 0 : index
    %15 = vector.load %arg6[%c0_13, %c0_14] : memref<1x128xf32, #tpu.memory_space<vmem>>, vector<1x128xf32>
    %16 = vector.broadcast %15 : vector<1x128xf32> to vector<64x128xf32>
    %17 = arith.mulf %14, %16 : vector<64x128xf32>
    %c0_15 = arith.constant 0 : index
    %c0_16 = arith.constant 0 : index
    %18 = vector.load %arg7[%c0_15, %c0_16] : memref<1x128xf32, #tpu.memory_space<vmem>>, vector<1x128xf32>
    %19 = vector.broadcast %18 : vector<1x128xf32> to vector<64x128xf32>
    %20 = arith.addf %17, %19 : vector<64x128xf32>
    %21 = arith.truncf %20 : vector<64x128xf32> to vector<64x128xbf16>
    %c0_17 = arith.constant 0 : index
    %c0_18 = arith.constant 0 : index
    %22 = vector.load %arg9[%c0_17, %c0_18] : memref<64x128xbf16, #tpu.memory_space<vmem>>, vector<64x128xbf16>
    tpu.vector_store %arg9[%c0_17, %c0_18], %21 {strides = array<i32>} : memref<64x128xbf16, #tpu.memory_space<vmem>>, vector<64x128xbf16>,
    return
  }
  func.func @transform_0(%arg0: i32) -> (i32, i32) {
    %c0_i32 = arith.constant 0 : i32
    %c0_i32_0 = arith.constant 0 : i32
    return %arg0, %c0_i32 : i32, i32
  }
  func.func @transform_1(%arg0: i32) -> (i32, i32) {
    %c0_i32 = arith.constant 0 : i32
    %c0_i32_0 = arith.constant 0 : i32
    %c0_i32_1 = arith.constant 0 : i32
    return %c0_i32, %c0_i32_0 : i32, i32
  }
  func.func @transform_2(%arg0: i32) -> (i32, i32) {
    %c0_i32 = arith.constant 0 : i32
    %c0_i32_0 = arith.constant 0 : i32
    %c0_i32_1 = arith.constant 0 : i32
    return %c0_i32, %c0_i32_0 : i32, i32
  }
  func.func @transform_3(%arg0: i32) -> (i32, i32) {
    %c0_i32 = arith.constant 0 : i32
    %c0_i32_0 = arith.constant 0 : i32
    %c0_i32_1 = arith.constant 0 : i32
    return %c0_i32, %c0_i32_0 : i32, i32
  }
  func.func @transform_4(%arg0: i32) -> (i32, i32) {
    %c0_i32 = arith.constant 0 : i32
    %c0_i32_0 = arith.constant 0 : i32
    %c0_i32_1 = arith.constant 0 : i32
    return %c0_i32, %c0_i32_0 : i32, i32
  }
  func.func @transform_5(%arg0: i32) -> (i32, i32) {
    %c0_i32 = arith.constant 0 : i32
    %c0_i32_0 = arith.constant 0 : i32
    %c0_i32_1 = arith.constant 0 : i32
    return %c0_i32, %c0_i32_0 : i32, i32
  }
  func.func @transform_6(%arg0: i32) -> (i32, i32) {
    %c0_i32 = arith.constant 0 : i32
    %c0_i32_0 = arith.constant 0 : i32
    %c0_i32_1 = arith.constant 0 : i32
    return %c0_i32, %c0_i32_0 : i32, i32
  }
  func.func @transform_7(%arg0: i32) -> (i32, i32) {
    %c0_i32 = arith.constant 0 : i32
    %c0_i32_0 = arith.constant 0 : i32
    return %arg0, %c0_i32 : i32, i32
  }
  func.func @transform_8(%arg0: i32) -> (i32, i32) {
    %c0_i32 = arith.constant 0 : i32
    %c0_i32_0 = arith.constant 0 : i32
    return %arg0, %c0_i32 : i32, i32
  }
}

module attributes {stable_mosaic.version = 11 : i64} {
  func.func @_conv3x3_bn_relu_kernel(%arg0: i32, %arg1: i32, %arg2: memref<1x1x18x18x64xbf16, #tpu.memory_space<vmem>>, %arg3: memref<576x64xbf16, #tpu.memory_space<vmem>>, %arg4: memref<1x64xf32, #tpu.memory_space<vmem>>, %arg5: memref<1x64xf32, #tpu.memory_space<vmem>>, %arg6: memref<1x2x16x64xbf16, #tpu.memory_space<vmem>>) attributes {dimension_semantics = [#tpu.dimension_semantics<parallel>, #tpu.dimension_semantics<parallel>], iteration_bounds = array<i64: 2, 8>, scalar_prefetch = 0 : i64, scratch_operands = 0 : i64, tpu.core_type = #tpu.core_type<tc>, window_params = [{transform_indices = @transform_0, window_bounds = array<i64: 1, 1, 18, 18, 64>}, {pipeline_mode = #tpu.pipeline_mode<synchronous>, transform_indices = @transform_1, window_bounds = array<i64: 576, 64>}, {pipeline_mode = #tpu.pipeline_mode<synchronous>, transform_indices = @transform_2, window_bounds = array<i64: 1, 64>}, {pipeline_mode = #tpu.pipeline_mode<synchronous>, transform_indices = @transform_3, window_bounds = array<i64: 1, 64>}, {transform_indices = @transform_4, window_bounds = array<i64: 1, 2, 16, 64>}]} {
    %c2_i32 = arith.constant 2 : i32
    %0 = arith.muli %arg1, %c2_i32 : i32
    %c0_i32 = arith.constant 0 : i32
    %1 = arith.addi %0, %c0_i32 : i32
    %c0 = arith.constant 0 : index
    %c0_0 = arith.constant 0 : index
    %2 = arith.index_cast %1 : i32 to index
    %c0_1 = arith.constant 0 : index
    %c0_2 = arith.constant 0 : index
    %3 = vector.load %arg2[%c0, %c0_0, %2, %c0_1, %c0_2] : memref<1x1x18x18x64xbf16, #tpu.memory_space<vmem>>, vector<1x1x2x16x64xbf16>
    %4 = vector.shape_cast %3 : vector<1x1x2x16x64xbf16> to vector<2x16x64xbf16>
    %c0_i32_3 = arith.constant 0 : i32
    %5 = arith.addi %0, %c0_i32_3 : i32
    %c0_4 = arith.constant 0 : index
    %c0_5 = arith.constant 0 : index
    %6 = arith.index_cast %5 : i32 to index
    %c1 = arith.constant 1 : index
    %c0_6 = arith.constant 0 : index
    %7 = vector.load %arg2[%c0_4, %c0_5, %6, %c1, %c0_6] : memref<1x1x18x18x64xbf16, #tpu.memory_space<vmem>>, vector<1x1x2x16x64xbf16>
    %8 = vector.shape_cast %7 : vector<1x1x2x16x64xbf16> to vector<2x16x64xbf16>
    %c0_i32_7 = arith.constant 0 : i32
    %9 = arith.addi %0, %c0_i32_7 : i32
    %c0_8 = arith.constant 0 : index
    %c0_9 = arith.constant 0 : index
    %10 = arith.index_cast %9 : i32 to index
    %c2 = arith.constant 2 : index
    %c0_10 = arith.constant 0 : index
    %11 = vector.load %arg2[%c0_8, %c0_9, %10, %c2, %c0_10] : memref<1x1x18x18x64xbf16, #tpu.memory_space<vmem>>, vector<1x1x2x16x64xbf16>
    %12 = vector.shape_cast %11 : vector<1x1x2x16x64xbf16> to vector<2x16x64xbf16>
    %c1_i32 = arith.constant 1 : i32
    %13 = arith.addi %0, %c1_i32 : i32
    %c0_11 = arith.constant 0 : index
    %c0_12 = arith.constant 0 : index
    %14 = arith.index_cast %13 : i32 to index
    %c0_13 = arith.constant 0 : index
    %c0_14 = arith.constant 0 : index
    %15 = vector.load %arg2[%c0_11, %c0_12, %14, %c0_13, %c0_14] : memref<1x1x18x18x64xbf16, #tpu.memory_space<vmem>>, vector<1x1x2x16x64xbf16>
    %16 = vector.shape_cast %15 : vector<1x1x2x16x64xbf16> to vector<2x16x64xbf16>
    %c1_i32_15 = arith.constant 1 : i32
    %17 = arith.addi %0, %c1_i32_15 : i32
    %c0_16 = arith.constant 0 : index
    %c0_17 = arith.constant 0 : index
    %18 = arith.index_cast %17 : i32 to index
    %c1_18 = arith.constant 1 : index
    %c0_19 = arith.constant 0 : index
    %19 = vector.load %arg2[%c0_16, %c0_17, %18, %c1_18, %c0_19] : memref<1x1x18x18x64xbf16, #tpu.memory_space<vmem>>, vector<1x1x2x16x64xbf16>
    %20 = vector.shape_cast %19 : vector<1x1x2x16x64xbf16> to vector<2x16x64xbf16>
    %c1_i32_20 = arith.constant 1 : i32
    %21 = arith.addi %0, %c1_i32_20 : i32
    %c0_21 = arith.constant 0 : index
    %c0_22 = arith.constant 0 : index
    %22 = arith.index_cast %21 : i32 to index
    %c2_23 = arith.constant 2 : index
    %c0_24 = arith.constant 0 : index
    %23 = vector.load %arg2[%c0_21, %c0_22, %22, %c2_23, %c0_24] : memref<1x1x18x18x64xbf16, #tpu.memory_space<vmem>>, vector<1x1x2x16x64xbf16>
    %24 = vector.shape_cast %23 : vector<1x1x2x16x64xbf16> to vector<2x16x64xbf16>
    %c2_i32_25 = arith.constant 2 : i32
    %25 = arith.addi %0, %c2_i32_25 : i32
    %c0_26 = arith.constant 0 : index
    %c0_27 = arith.constant 0 : index
    %26 = arith.index_cast %25 : i32 to index
    %c0_28 = arith.constant 0 : index
    %c0_29 = arith.constant 0 : index
    %27 = vector.load %arg2[%c0_26, %c0_27, %26, %c0_28, %c0_29] : memref<1x1x18x18x64xbf16, #tpu.memory_space<vmem>>, vector<1x1x2x16x64xbf16>
    %28 = vector.shape_cast %27 : vector<1x1x2x16x64xbf16> to vector<2x16x64xbf16>
    %c2_i32_30 = arith.constant 2 : i32
    %29 = arith.addi %0, %c2_i32_30 : i32
    %c0_31 = arith.constant 0 : index
    %c0_32 = arith.constant 0 : index
    %30 = arith.index_cast %29 : i32 to index
    %c1_33 = arith.constant 1 : index
    %c0_34 = arith.constant 0 : index
    %31 = vector.load %arg2[%c0_31, %c0_32, %30, %c1_33, %c0_34] : memref<1x1x18x18x64xbf16, #tpu.memory_space<vmem>>, vector<1x1x2x16x64xbf16>
    %32 = vector.shape_cast %31 : vector<1x1x2x16x64xbf16> to vector<2x16x64xbf16>
    %c2_i32_35 = arith.constant 2 : i32
    %33 = arith.addi %0, %c2_i32_35 : i32
    %c0_36 = arith.constant 0 : index
    %c0_37 = arith.constant 0 : index
    %34 = arith.index_cast %33 : i32 to index
    %c2_38 = arith.constant 2 : index
    %c0_39 = arith.constant 0 : index
    %35 = vector.load %arg2[%c0_36, %c0_37, %34, %c2_38, %c0_39] : memref<1x1x18x18x64xbf16, #tpu.memory_space<vmem>>, vector<1x1x2x16x64xbf16>
    %36 = vector.shape_cast %35 : vector<1x1x2x16x64xbf16> to vector<2x16x64xbf16>
    %37 = tpu.concatenate %4, %8, %12, %16, %20, %24, %28, %32, %36 in 2 : vector<2x16x64xbf16>, vector<2x16x64xbf16>, vector<2x16x64xbf16>, vector<2x16x64xbf16>, vector<2x16x64xbf16>, vector<2x16x64xbf16>, vector<2x16x64xbf16>, vector<2x16x64xbf16>, vector<2x16x64xbf16> -> vector<2x16x576xbf16>
    %38 = vector.shape_cast %37 : vector<2x16x576xbf16> to vector<32x576xbf16>
    %c0_40 = arith.constant 0 : index
    %c0_41 = arith.constant 0 : index
    %39 = vector.load %arg3[%c0_40, %c0_41] : memref<576x64xbf16, #tpu.memory_space<vmem>>, vector<576x64xbf16>
    %cst = arith.constant dense<0.000000e+00> : vector<32x64xf32>
    %40 = tpu.matmul %38, %39, %cst {dimension_numbers = #tpu.dot_dimension_numbers<[1], [0], [0], [1], [0, 0, 1, 1], [], []>} : vector<32x576xbf16>, vector<576x64xbf16>, vector<32x64xf32> -> vector<32x64xf32>
    %c0_42 = arith.constant 0 : index
    %c0_43 = arith.constant 0 : index
    %41 = vector.load %arg4[%c0_42, %c0_43] : memref<1x64xf32, #tpu.memory_space<vmem>>, vector<1x64xf32>
    %42 = vector.broadcast %41 : vector<1x64xf32> to vector<32x64xf32>
    %43 = arith.mulf %40, %42 : vector<32x64xf32>
    %c0_44 = arith.constant 0 : index
    %c0_45 = arith.constant 0 : index
    %44 = vector.load %arg5[%c0_44, %c0_45] : memref<1x64xf32, #tpu.memory_space<vmem>>, vector<1x64xf32>
    %45 = vector.broadcast %44 : vector<1x64xf32> to vector<32x64xf32>
    %46 = arith.addf %43, %45 : vector<32x64xf32>
    %cst_46 = arith.constant 0.000000e+00 : f32
    %47 = vector.broadcast %cst_46 : f32 to vector<32x64xf32>
    %48 = arith.maximumf %46, %47 : vector<32x64xf32>
    %49 = vector.shape_cast %48 : vector<32x64xf32> to vector<2x16x64xf32>
    %50 = arith.truncf %49 : vector<2x16x64xf32> to vector<2x16x64xbf16>
    %c0_47 = arith.constant 0 : index
    %c0_48 = arith.constant 0 : index
    %c0_49 = arith.constant 0 : index
    %c0_50 = arith.constant 0 : index
    %51 = vector.load %arg6[%c0_47, %c0_48, %c0_49, %c0_50] : memref<1x2x16x64xbf16, #tpu.memory_space<vmem>>, vector<1x2x16x64xbf16>
    %52 = vector.shape_cast %51 : vector<1x2x16x64xbf16> to vector<2x16x64xbf16>
    %53 = vector.shape_cast %50 : vector<2x16x64xbf16> to vector<1x2x16x64xbf16>
    tpu.vector_store %arg6[%c0_47, %c0_48, %c0_49, %c0_50], %53 {strides = array<i32>} : memref<1x2x16x64xbf16, #tpu.memory_space<vmem>>, vector<1x2x16x64xbf16>,
    return
  }
  func.func @transform_0(%arg0: i32, %arg1: i32) -> (i32, i32, i32, i32, i32) {
    %c0_i32 = arith.constant 0 : i32
    %c0_i32_0 = arith.constant 0 : i32
    %c0_i32_1 = arith.constant 0 : i32
    %c0_i32_2 = arith.constant 0 : i32
    %c0_i32_3 = arith.constant 0 : i32
    return %arg0, %c0_i32, %c0_i32_0, %c0_i32_1, %c0_i32_2 : i32, i32, i32, i32, i32
  }
  func.func @transform_1(%arg0: i32, %arg1: i32) -> (i32, i32) {
    %c0_i32 = arith.constant 0 : i32
    %c0_i32_0 = arith.constant 0 : i32
    %c0_i32_1 = arith.constant 0 : i32
    return %c0_i32, %c0_i32_0 : i32, i32
  }
  func.func @transform_2(%arg0: i32, %arg1: i32) -> (i32, i32) {
    %c0_i32 = arith.constant 0 : i32
    %c0_i32_0 = arith.constant 0 : i32
    %c0_i32_1 = arith.constant 0 : i32
    return %c0_i32, %c0_i32_0 : i32, i32
  }
  func.func @transform_3(%arg0: i32, %arg1: i32) -> (i32, i32) {
    %c0_i32 = arith.constant 0 : i32
    %c0_i32_0 = arith.constant 0 : i32
    %c0_i32_1 = arith.constant 0 : i32
    return %c0_i32, %c0_i32_0 : i32, i32
  }
  func.func @transform_4(%arg0: i32, %arg1: i32) -> (i32, i32, i32, i32) {
    %c0_i32 = arith.constant 0 : i32
    %c0_i32_0 = arith.constant 0 : i32
    %c0_i32_1 = arith.constant 0 : i32
    return %arg0, %arg1, %c0_i32, %c0_i32_0 : i32, i32, i32, i32
  }
}

module attributes {stable_mosaic.version = 11 : i64} {
  func.func @_mm_bn_add_relu_kernel(%arg0: i32, %arg1: memref<64x64xbf16, #tpu.memory_space<vmem>>, %arg2: memref<64x128xbf16, #tpu.memory_space<vmem>>, %arg3: memref<1x128xf32, #tpu.memory_space<vmem>>, %arg4: memref<1x128xf32, #tpu.memory_space<vmem>>, %arg5: memref<64x128xbf16, #tpu.memory_space<vmem>>, %arg6: memref<64x128xf32, #tpu.memory_space<vmem>>) attributes {dimension_semantics = [#tpu.dimension_semantics<parallel>], iteration_bounds = array<i64: 8>, scalar_prefetch = 0 : i64, scratch_operands = 0 : i64, tpu.core_type = #tpu.core_type<tc>, window_params = [{transform_indices = @transform_0, window_bounds = array<i64: 64, 64>}, {pipeline_mode = #tpu.pipeline_mode<synchronous>, transform_indices = @transform_1, window_bounds = array<i64: 64, 128>}, {pipeline_mode = #tpu.pipeline_mode<synchronous>, transform_indices = @transform_2, window_bounds = array<i64: 1, 128>}, {pipeline_mode = #tpu.pipeline_mode<synchronous>, transform_indices = @transform_3, window_bounds = array<i64: 1, 128>}, {transform_indices = @transform_4, window_bounds = array<i64: 64, 128>}, {transform_indices = @transform_5, window_bounds = array<i64: 64, 128>}]} {
    %c0 = arith.constant 0 : index
    %c0_0 = arith.constant 0 : index
    %0 = vector.load %arg1[%c0, %c0_0] : memref<64x64xbf16, #tpu.memory_space<vmem>>, vector<64x64xbf16>
    %c0_1 = arith.constant 0 : index
    %c0_2 = arith.constant 0 : index
    %1 = vector.load %arg2[%c0_1, %c0_2] : memref<64x128xbf16, #tpu.memory_space<vmem>>, vector<64x128xbf16>
    %cst = arith.constant dense<0.000000e+00> : vector<64x128xf32>
    %2 = tpu.matmul %0, %1, %cst {dimension_numbers = #tpu.dot_dimension_numbers<[1], [0], [0], [1], [0, 0, 1, 1], [], []>} : vector<64x64xbf16>, vector<64x128xbf16>, vector<64x128xf32> -> vector<64x128xf32>
    %c0_3 = arith.constant 0 : index
    %c0_4 = arith.constant 0 : index
    %3 = vector.load %arg3[%c0_3, %c0_4] : memref<1x128xf32, #tpu.memory_space<vmem>>, vector<1x128xf32>
    %4 = vector.broadcast %3 : vector<1x128xf32> to vector<64x128xf32>
    %5 = arith.mulf %2, %4 : vector<64x128xf32>
    %c0_5 = arith.constant 0 : index
    %c0_6 = arith.constant 0 : index
    %6 = vector.load %arg4[%c0_5, %c0_6] : memref<1x128xf32, #tpu.memory_space<vmem>>, vector<1x128xf32>
    %7 = vector.broadcast %6 : vector<1x128xf32> to vector<64x128xf32>
    %8 = arith.addf %5, %7 : vector<64x128xf32>
    %c0_7 = arith.constant 0 : index
    %c0_8 = arith.constant 0 : index
    %9 = vector.load %arg5[%c0_7, %c0_8] : memref<64x128xbf16, #tpu.memory_space<vmem>>, vector<64x128xbf16>
    %10 = arith.extf %9 : vector<64x128xbf16> to vector<64x128xf32>
    %11 = arith.addf %8, %10 : vector<64x128xf32>
    %cst_9 = arith.constant 0.000000e+00 : f32
    %12 = vector.broadcast %cst_9 : f32 to vector<64x128xf32>
    %13 = arith.maximumf %11, %12 : vector<64x128xf32>
    %c0_10 = arith.constant 0 : index
    %c0_11 = arith.constant 0 : index
    %14 = vector.load %arg6[%c0_10, %c0_11] : memref<64x128xf32, #tpu.memory_space<vmem>>, vector<64x128xf32>
    tpu.vector_store %arg6[%c0_10, %c0_11], %13 {strides = array<i32>} : memref<64x128xf32, #tpu.memory_space<vmem>>, vector<64x128xf32>,
    return
  }
  func.func @transform_0(%arg0: i32) -> (i32, i32) {
    %c0_i32 = arith.constant 0 : i32
    %c0_i32_0 = arith.constant 0 : i32
    return %arg0, %c0_i32 : i32, i32
  }
  func.func @transform_1(%arg0: i32) -> (i32, i32) {
    %c0_i32 = arith.constant 0 : i32
    %c0_i32_0 = arith.constant 0 : i32
    %c0_i32_1 = arith.constant 0 : i32
    return %c0_i32, %c0_i32_0 : i32, i32
  }
  func.func @transform_2(%arg0: i32) -> (i32, i32) {
    %c0_i32 = arith.constant 0 : i32
    %c0_i32_0 = arith.constant 0 : i32
    %c0_i32_1 = arith.constant 0 : i32
    return %c0_i32, %c0_i32_0 : i32, i32
  }
  func.func @transform_3(%arg0: i32) -> (i32, i32) {
    %c0_i32 = arith.constant 0 : i32
    %c0_i32_0 = arith.constant 0 : i32
    %c0_i32_1 = arith.constant 0 : i32
    return %c0_i32, %c0_i32_0 : i32, i32
  }
  func.func @transform_4(%arg0: i32) -> (i32, i32) {
    %c0_i32 = arith.constant 0 : i32
    %c0_i32_0 = arith.constant 0 : i32
    return %arg0, %c0_i32 : i32, i32
  }
  func.func @transform_5(%arg0: i32) -> (i32, i32) {
    %c0_i32 = arith.constant 0 : i32
    %c0_i32_0 = arith.constant 0 : i32
    return %arg0, %c0_i32 : i32, i32
  }
}

</mosaic_0001>

<bundles_post_ra>
// kernel: bottleneck_forward.3
= control target key start
LH: loop header
LB: loop body
LE: loop exit
PB: predicated region body
PF: predicated region fallthrough
CT: control target
= control target key end

     0   :  { %s1011_s27 = smov 0   ;;  %s1144_s0 = inlined_call_operand.vmem [shape: bf16[512,64], index: 0, kind: input, shape index: {}]   ;;  %s1145_s1 = inlined_call_operand.vmem [shape: bf16[64,64], index: 1, kind: input, shape index: {}]   ;;  %s1146_s2 = inlined_call_operand.vmem [shape: f32[1,64], index: 2, kind: input, shape index: {}]   ;;  %s1147_s3 = inlined_call_operand.vmem [shape: f32[1,64], index: 3, kind: input, shape index: {}]   ;;  %s1148_s4 = inlined_call_operand.vmem [shape: bf16[64,128], index: 4, kind: input, shape index: {}]   ;;  %s1149_s5 = inlined_call_operand.vmem [shape: f32[1,128], index: 5, kind: input, shape index: {}]   ;;  %s1150_s6 = inlined_call_operand.vmem [shape: f32[1,128], index: 6, kind: input, shape index: {}]   ;;  %s1151_s7 = inlined_call_operand.vmem [shape: bf16[512,64], index: 7, kind: output, shape index: {0}]   ;;  %s1152_s8 = inlined_call_operand.vmem [shape: bf16[512,128], index: 8, kind: output, shape index: {1}]  }
   0x1 LB: > { %s798_s28 = sadd.s32 4294967295, %s964_s27   ;;  %p802_p0 = scmp.ge.s32.totalorder %s964_s27, 1  ;;  %s964_s27 = sphi %s1011_s27, %s19_s27  }
   0x2   : > { %p266_p1 = scmp.lt.s32.totalorder %s964_s27, 9 }
   0x4   : > { %p267_p2 = pnand %p802_p0, %p266_p1 }
   0x5   : > { %s803_s9 = sshll.u32 (!%p267_p2), %s798_s28, 3 }
   0x6   : > { %270 = sbr.rel (%p267_p2) target bundleno = 244 (0xf4), region = 48  ;;  %p306_p3 = scmp.lt.s32.totalorder (!%p267_p2), %s803_s9, 63 }
   0xb   : > { %v946_v0 = vld [vmem:[%s1145_s1 + $0x18] sm:$0xff]   ;;  %v948_v2 = vld [vmem:[%s1145_s1 + $0x10] sm:$0xff]   ;;  %s1154_s9 = smov (!%p306_p3, %s803_s9), 63  ;;  %v950_v4 = vld [vmem:[%s1145_s1 + $0x8] sm:$0xff]   ;;  %vm384_vm0 = vcmask 523264   ;;  %vm532_vm1 = vcmask 519168  }
   0xc   : > { %v947_v1 = vld [vmem:[%s1148_s4 + $0x18] sm:$0xff]   ;;  %906 = vmatprep.subr.bf16.mxu0 %v946_v0  ;;  %v949_v3 = vld [vmem:[%s1148_s4 + $0x10] sm:$0xff]   ;;  %v951_v5 = vld [vmem:[%s1148_s4 + $0x8] sm:$0xff]   ;;  %s1037_s20 = sshll.u32 %s1154_s9, 2 }
   0xd   : > { %922 = vmatprep.subr.bf16.mxu1 %v947_v1  ;;  %907 = vmatpush3.bf16.msra.mxu0 %v946_v0  ;;  %s309_s23 = scalar_lea.vmem %s1144_s0, %s1037_s20  ;;  %v952_v6 = vld [vmem:[%s1145_s1] sm:$0xff]   ;;  %s1087_s17 = scalar_lea.vmem %s1151_s7, %s1037_s20 }
   0xe   : > { %923 = vmatpush3.bf16.msra.mxu1 %v947_v1  ;;  %908 = vmatprep.subr.bf16.mxu0 %v948_v2  ;;  %v954_v7 = vld [vmem:[%s309_s23] sm:$0xff]   ;;  %v955_v9 = vld [vmem:[%s309_s23 + $0x8] sm:$0xff]   ;;  %v956_v10 = vld [vmem:[%s309_s23 + $0x10] sm:$0xff]   ;;  %s1102_s21 = scalar_lea.vmem %s1152_s8, %s1037_s20 }
   0xf   : > { %924 = vmatprep.subr.bf16.mxu1 %v949_v3  ;;  %v953_v8 = vld [vmem:[%s1148_s4] sm:$0xff]   ;;  %914 = vmatprep.mubr.msk.bf16.mxu0 %vm384_vm0, %v954_v7  ;;  %v957_v11 = vld [vmem:[%s309_s23 + $0x18] sm:$0xff]  }
  0x10   : > { %930 = vmatprep.mubr.msk.bf16.mxu1 %vm384_vm0, %v954_v7  ;;  %v1060_v12 = vld [vmem:[%s1146_s2] ss:$0 sm:$0xff] }
  0x11   : > { %909 = vmatpush3.bf16.msra.mxu0 %v948_v2  ;;  %v1065_v14 = vld [vmem:[%s1147_s3] ss:$0 sm:$0xff] }
  0x12   : > { %925 = vmatpush3.bf16.msra.mxu1 %v949_v3  ;;  %910 = vmatprep.subr.bf16.mxu0 %v950_v4  ;;  %v1071_v17 = vld [vmem:[%s1149_s5] ss:$0 sm:$0xff] }
  0x13   : > { %926 = vmatprep.subr.bf16.mxu1 %v951_v5  ;;  %v1079_v25 = vld [vmem:[%s1150_s6] ss:$0 sm:$0xff] }
  0x15   : > { %911 = vmatpush3.bf16.msra.mxu0 %v950_v4 }
  0x16   : > { %927 = vmatpush3.bf16.msra.mxu1 %v951_v5  ;;  %912 = vmatprep.subr.bf16.mxu0 %v952_v6 }
  0x17   : > { %928 = vmatprep.subr.bf16.mxu1 %v953_v8 }
  0x19   : > { %913 = vmatpush3.bf16.msra.mxu0 %v952_v6 }
  0x1a   : > { %929 = vmatpush3.bf16.msra.mxu1 %v953_v8 }
  0x1c   : > { %915 = vmatmul.mubr.msk.bf16.vlgmr.msra.gmra.mxu0 %vm384_vm0, %v955_v9 }
  0x1d   : > { %931 = vmatmul.mubr.msk.bf16.vlgmr.msra.gmra.mxu1 %vm384_vm0, %v955_v9  ;;  %918 = vmatprep.mubr.msk.bf16.mxu0 %vm384_vm0, %v956_v10 }
  0x1e   : > { %934 = vmatprep.mubr.msk.bf16.mxu1 %vm384_vm0, %v956_v10 }
  0x24   : > { %919 = vmatmul.mubr.msk.bf16.gmra.mxu0 %vm384_vm0, %v957_v11 }
  0x25   : > { %935 = vmatmul.mubr.msk.bf16.gmra.mxu1 %vm384_vm0, %v957_v11 }
  0xdc   : > { %v916_v13 = vpop.f32.mrf.mxu0 }
  0xdd   : > { %v471_v15 = vmul.f32 %v916_v13, %v1060_v12  ;;  %v932_v16 = vpop.f32.mrf.mxu1 }
  0xde   : > { %v431_v18 = vpop.f32.mrf.mxu0  ;;  %v647_v22 = vmul.f32 %v932_v16, %v1071_v17 }
  0xdf   : > { %v486_v19 = vadd.f32 %v1065_v14, %v471_v15  ;;  %v469_v20 = vmul.f32 %v1060_v12, %v431_v18  ;;  %v607_v21 = vpop.f32.mrf.mxu1 }
  0xe0   : > { %v917_v23 = vpop.f32.mrf.mxu0  ;;  %v645_v29 = vmul.f32 %v1071_v17, %v607_v21  ;;  %v662_v37 = vadd.f32 %v1079_v25, %v647_v22 }
  0xe1   : > { %v494_v24 = vmax.f32 %v486_v19, 0.0  ;;  %v484_v26 = vadd.f32 %v1065_v14, %v469_v20  ;;  %v472_v27 = vmul.f32 %v917_v23, %v1060_v12  ;;  %v933_v28 = vpop.f32.mrf.mxu1 }
  0xe2   : > { %v648_v30 = vmul.f32 %v933_v28, %v1071_v17  ;;  %v434_v31 = vpop.f32.mrf.mxu0  ;;  %v660_v46 = vadd.f32 %v1079_v25, %v645_v29 }
  0xe3   : > { %v853_v32 = vpack.c.bf16 %v494_v24, %v494_v24  ;;  %v492_v33 = vmax.f32 %v484_v26, 0.0  ;;  %v487_v34 = vadd.f32 %v1065_v14, %v472_v27  ;;  %v470_v35 = vmul.f32 %v1060_v12, %v434_v31  ;;  %v610_v36 = vpop.f32.mrf.mxu1 }
  0xe4   : > { %v663_v38 = vadd.f32 %v1079_v25, %v648_v30  ;;  %v646_v39 = vmul.f32 %v1071_v17, %v610_v36  ;;  %v920_v40 = vpop.f32.mrf.mxu0 }
  0xe5   : > { %535 = vst.msk [vmem:[%s1087_s17 + $0x8] sm:$0xf] %vm532_vm1, %v853_v32  ;;  %v851_v41 = vpack.c.bf16 %v492_v33, %v492_v33  ;;  %v495_v42 = vmax.f32 %v487_v34, 0.0  ;;  %v485_v43 = vadd.f32 %v1065_v14, %v470_v35  ;;  %v475_v44 = vmul.f32 %v920_v40, %v1060_v12  ;;  %v936_v45 = vpop.f32.mrf.mxu1 }
  0xe6   : > { %v875_v47 = vpack.c.bf16 %v663_v38, %v662_v37  ;;  %v661_v48 = vadd.f32 %v1079_v25, %v646_v39  ;;  %v447_v49 = vpop.f32.mrf.mxu0  ;;  %v651_v56 = vmul.f32 %v936_v45, %v1071_v17 }
  0xe7   : > { %533 = vst.msk [vmem:[%s1087_s17] sm:$0xf] %vm532_vm1, %v851_v41  ;;  %v854_v50 = vpack.c.bf16 %v495_v42, %v495_v42  ;;  %v493_v51 = vmax.f32 %v485_v43, 0.0  ;;  %v490_v52 = vadd.f32 %v1065_v14, %v475_v44  ;;  %v473_v53 = vmul.f32 %v1060_v12, %v447_v49  ;;  %v623_v54 = vpop.f32.mrf.mxu1 }
  0xe8   : > { %887 = vst [vmem:[%s1102_s21 + $0x8] sm:$0xff] %v875_v47   ;;  %v870_v55 = vpack.c.bf16 %v661_v48, %v660_v46  ;;  %v921_v57 = vpop.f32.mrf.mxu0  ;;  %v649_v63 = vmul.f32 %v1071_v17, %v623_v54  ;;  %v666_v7 = vadd.f32 %v1079_v25, %v651_v56 }
  0xe9   : > { %536 = vst.msk [vmem:[%s1087_s17 + $0xc] sm:$0xf] %vm532_vm1, %v854_v50  ;;  %v852_v58 = vpack.c.bf16 %v493_v51, %v493_v51  ;;  %v498_v59 = vmax.f32 %v490_v52, 0.0  ;;  %v488_v60 = vadd.f32 %v1065_v14, %v473_v53  ;;  %v476_v61 = vmul.f32 %v921_v57, %v1060_v12  ;;  %v937_v62 = vpop.f32.mrf.mxu1 }
  0xea   : > { %871 = vst [vmem:[%s1102_s21] sm:$0xff] %v870_v55   ;;  %v652_v0 = vmul.f32 %v937_v62, %v1071_v17  ;;  %v450_v1 = vpop.f32.mrf.mxu0  ;;  %v664_v15 = vadd.f32 %v1079_v25, %v649_v63 }
  0xeb   : > { %534 = vst.msk [vmem:[%s1087_s17 + $0x4] sm:$0xf] %vm532_vm1, %v852_v58  ;;  %v857_v2 = vpack.c.bf16 %v498_v59, %v498_v59  ;;  %v496_v3 = vmax.f32 %v488_v60, 0.0  ;;  %v491_v4 = vadd.f32 %v1065_v14, %v476_v61  ;;  %v474_v5 = vmul.f32 %v1060_v12, %v450_v1  ;;  %v626_v6 = vpop.f32.mrf.mxu1 }
  0xec   : > { %v667_v8 = vadd.f32 %v1079_v25, %v652_v0  ;;  %v650_v9 = vmul.f32 %v1071_v17, %v626_v6 }
  0xed   : > { %539 = vst.msk [vmem:[%s1087_s17 + $0x18] sm:$0xf] %vm532_vm1, %v857_v2  ;;  %v855_v10 = vpack.c.bf16 %v496_v3, %v496_v3  ;;  %v499_v11 = vmax.f32 %v491_v4, 0.0  ;;  %v489_v13 = vadd.f32 %v1065_v14, %v474_v5 }
  0xee   : > { %v885_v16 = vpack.c.bf16 %v667_v8, %v666_v7  ;;  %v665_v12 = vadd.f32 %v1079_v25, %v650_v9 }
  0xef   : > { %537 = vst.msk [vmem:[%s1087_s17 + $0x10] sm:$0xf] %vm532_vm1, %v855_v10  ;;  %v858_v18 = vpack.c.bf16 %v499_v11, %v499_v11  ;;  %v497_v19 = vmax.f32 %v489_v13, 0.0 }
  0xf0   : > { %889 = vst [vmem:[%s1102_s21 + $0x18] sm:$0xff] %v885_v16   ;;  %v880_v20 = vpack.c.bf16 %v665_v12, %v664_v15 }
  0xf1   : > { %540 = vst.msk [vmem:[%s1087_s17 + $0x1c] sm:$0xf] %vm532_vm1, %v858_v18  ;;  %v856_v17 = vpack.c.bf16 %v497_v19, %v497_v19 }
  0xf2   : > { %888 = vst [vmem:[%s1102_s21 + $0x10] sm:$0xff] %v880_v20  }
  0xf3   : > { %538 = vst.msk [vmem:[%s1087_s17 + $0x14] sm:$0xf] %vm532_vm1, %v856_v17 }
  0xf4 PF: > { %s19_s27 = sadd.s32 1, %s964_s27  }
  0xf5   : > { %p16_p4 = scmp.ge.s32.totalorder %s19_s27, 10  }
  0xf7   :  { %18 = sbr.rel (!%p16_p4) target bundleno = 1 (0x1), region = 90 }

// kernel: bottleneck_forward.5
= control target key start
LH: loop header
LB: loop body
LE: loop exit
PB: predicated region body
PF: predicated region fallthrough
CT: control target
= control target key end

     0   :  { %10 = vsyncpa [#allocation3], 0  ;;  %s899_s0 = inlined_call_operand.vmem [shape: bf16[512,64], index: 0, kind: input, shape index: {}]   ;;  %s900_s1 = inlined_call_operand.vmem [shape: bf16[64,128], index: 1, kind: input, shape index: {}]   ;;  %s901_s2 = inlined_call_operand.vmem [shape: f32[1,128], index: 2, kind: input, shape index: {}]   ;;  %s902_s3 = inlined_call_operand.vmem [shape: f32[1,128], index: 3, kind: input, shape index: {}]   ;;  %s903_s4 = inlined_call_operand.vmem [shape: bf16[512,128], index: 4, kind: input, shape index: {}]   ;;  %s904_s5 = inlined_call_operand.hbm [shape: f32[512,128], index: 5, kind: output, shape index: {}]  }
   0x1   :  { %12 = vsyncpa [#allocation3 + $0x1], 0  ;;  %s769_s18 = smov 0   ;;  %s771_s19 = smov 0  }
   0x2   :  { %s773_s20 = smov 0   ;;  %s775_s21 = smov 0  }
   0x3 LB: > { %s790_s22 = sadd.s32 4294967295, %s734_s21   ;;  %s545_s23 = sadd.s32 4294967294, %s734_s21   ;;  %s734_s21 = sphi %s775_s21, %s910_s21   ;;  %s730_s20 = sphi %s773_s20, %s909_s20   ;;  %s726_s19 = sphi %s771_s19, %s908_s19   ;;  %s722_s18 = sphi %s769_s18, %s907_s18  }
   0x4   : > { %s794_s24 = sadd.s32 1, %s734_s21   ;;  %s140_s25 = sadd.s32 1, %s730_s20 }
   0x5   : > { %s137_s26 = ssub.s32 %s734_s21, %s794_s24  ;;  %p150_p0 = scmp.ne.s32.totalorder %s730_s20, %s726_s19 }
   0x6   : > { %p138_p1 = scmp.eq.s32.totalorder %s137_s26, 0  ;;  %p151_p2 = scmp.eq.s32.totalorder %s790_s22, 7 }
   0x7   : > { %p156_p3 = scmp.ne.s32.totalorder %s726_s19, %s722_s18  ;;  %p157_p4 = scmp.eq.s32.totalorder %s545_s23, 7 }
   0x8   : > { %s805_s27 = scalar_select %p138_p1, %s730_s20, %s140_s25  }
   0x9   : > { %p807_p5 = por %p151_p2, %p150_p0  ;;  %p811_p6 = por %p157_p4, %p156_p3 }
   0xa   : > { %p548_p7 = scmp.ge.s32.totalorder %s734_s21, 1  ;;  %p202_p8 = scmp.lt.s32.totalorder %s734_s21, 9 }
   0xc   : > { %p203_p9 = pnand %p548_p7, %p202_p8 }
   0xd   : > { %s550_s7 = sshll.u32 (!%p203_p9), %s790_s22, 3  ;;  %s736_s23 = smov (!%p203_p9), [#allocation2]  }
   0xe   : > { %206 = sbr.rel (%p203_p9) target bundleno = 258 (0x102), region = 40  ;;  %p236_p10 = scmp.lt.s32.totalorder (!%p203_p9), %s550_s7, 63 }
   0xf   : > { %s678_s25 = sshll.u32 (!%p203_p9), %s736_s23, 4  ;;  %s679_s25 = int_to_ptr.vmem [resolvable:$false] %s678_s25 }
  0x13   : > { %v666_v0 = vld [vmem:[%s900_s1 + $0x18] sm:$0xff]   ;;  %v667_v1 = vld [vmem:[%s900_s1 + $0x10] sm:$0xff]   ;;  %s912_s7 = smov (!%p236_p10, %s550_s7), 63  ;;  %v668_v2 = vld [vmem:[%s900_s1 + $0x8] sm:$0xff]   ;;  %vm309_vm0 = vcmask 523264  }
  0x14   : > { %601 = vmatprep.subr.bf16.mxu0 %v666_v0  ;;  %617 = vmatprep.subr.bf16.mxu1 %v666_v0  ;;  %s551_s12 = sshll.u32 %s912_s7, 2  ;;  %v669_v3 = vld [vmem:[%s900_s1] sm:$0xff]   ;;  %s232_s7 = sand.u32 1, %s726_s19  }
  0x15   : > { %602 = vmatpush3.bf16.msra.mxu0 %v666_v0  ;;  %621 = vmatpush3.bf16.msra.mxu1 %v666_v0  ;;  %s239_s17 = scalar_lea.vmem %s899_s0, %s551_s12  ;;  %s245_s26 = scalar_lea.vmem %s903_s4, %s551_s12  ;;  %v566_v8 = vld [vmem:[%s901_s2] ss:$0 sm:$0xff] }
  0x16   : > { %603 = vmatprep.subr.bf16.mxu0 %v667_v1  ;;  %618 = vmatprep.subr.bf16.mxu1 %v667_v1  ;;  %v670_v4 = vld [vmem:[%s239_s17] sm:$0xff]   ;;  %v671_v5 = vld [vmem:[%s239_s17 + $0x10] sm:$0xff]   ;;  %v672_v6 = vld [vmem:[%s239_s17 + $0x8] sm:$0xff]   ;;  %s549_s10 = sshll.u32 %s232_s7, 6  ;;  %s573_s12 = sshll.u32 %s790_s22, 10 }
  0x17   : > { %609 = vmatprep.mubr.msk.bf16.mxu0 %vm309_vm0, %v670_v4  ;;  %613 = vmatprep.mubr.msk.bf16.mxu1 %vm309_vm0, %v671_v5  ;;  %v673_v7 = vld [vmem:[%s239_s17 + $0x18] sm:$0xff]   ;;  %v590_v9 = vld [vmem:[%s245_s26 + $0x8] sm:$0xff]   ;;  %v575_v11 = vld [vmem:[%s245_s26] sm:$0xff]   ;;  %s234_s11 = scalar_lea.vmem [#allocation2], %s549_s10  ;;  %s853_s16 = scalar_lea.hbm %s904_s5, %s573_s12 }
  0x18   : > { %v592_v10 = vld [vmem:[%s245_s26 + $0x18] sm:$0xff]   ;;  %v591_v12 = vld [vmem:[%s245_s26 + $0x10] sm:$0xff]   ;;  %v567_v14 = vld [vmem:[%s902_s3] ss:$0 sm:$0xff]  ;;  %v580_v17 = vunpack.c.l.bf16 %v590_v9  ;;  %v576_v21 = vunpack.c.l.bf16 %v575_v11  ;;  %v581_v29 = vunpack.c.h.bf16 %v590_v9  ;;  %v577_v39 = vunpack.c.h.bf16 %v575_v11  ;;  %s471_s13 = sshll.u32 %s234_s11, 4  ;;  %s859_s22 = scalar_lea.sflag [#allocation3], %s232_s7  ;;  %s855_s13 = int_to_ptr.vmem [resolvable:$true] %s471_s13 }
  0x19   : > { %604 = vmatpush3.bf16.msra.mxu0 %v667_v1  ;;  %622 = vmatpush3.bf16.msra.mxu1 %v667_v1  ;;  %v588_v19 = vunpack.c.l.bf16 %v592_v10  ;;  %v584_v23 = vunpack.c.l.bf16 %v591_v12  ;;  %v589_v31 = vunpack.c.h.bf16 %v592_v10  ;;  %v585_v41 = vunpack.c.h.bf16 %v591_v12  ;;  %s674_s17 = scalar_lea.vmem %s855_s13, 1024  ;;  %s680_s26 = scalar_lea.vmem %s679_s25, 2048 }
  0x1a   : > { %605 = vmatprep.subr.bf16.mxu0 %v668_v2  ;;  %619 = vmatprep.subr.bf16.mxu1 %v668_v2  ;;  %p675_p11 = scmp.ne.s32.totalorder %s855_s13, %s674_s17  ;;  %p681_p0 = scmp.lt.s32.totalorder %s855_s13, %s679_s25 }
  0x1b   : > { %p682_p1 = scmp.lt.s32.totalorder %s680_s26, %s674_s17 }
  0x1c   : > { %p676_p12 = pnand %p675_p11, %p807_p5 }
  0x1d   : > { %606 = vmatpush3.bf16.msra.mxu0 %v668_v2  ;;  %623 = vmatpush3.bf16.msra.mxu1 %v668_v2  ;;  %p683_p2 = por %p682_p1, %p681_p0 }
  0x1e   : > { %607 = vmatprep.subr.bf16.mxu0 %v669_v3  ;;  %620 = vmatprep.subr.bf16.mxu1 %v669_v3  ;;  %p677_p13 = pneg %p676_p12 }
  0x20   : > { %p684_p3 = pnand %p683_p2, %p677_p13 }
  0x21   : > { %608 = vmatpush3.bf16.msra.mxu0 %v669_v3  ;;  %624 = vmatpush3.bf16.msra.mxu1 %v669_v3 }
  0x24   : > { %610 = vmatmul.mubr.msk.bf16.vlgmr.msra.gmra.mxu0 %vm309_vm0, %v672_v6  ;;  %614 = vmatmul.mubr.msk.bf16.vlgmr.msra.gmra.mxu1 %vm309_vm0, %v673_v7 }
  0xe4   : > { %v611_v13 = vpop.f32.mrf.mxu0  ;;  %v615_v15 = vpop.f32.mrf.mxu1 }
  0xe5   : > { %v396_v16 = vmul.f32 %v611_v13, %v566_v8  ;;  %v400_v18 = vmul.f32 %v615_v15, %v566_v8 }
  0xe6   : > { %v356_v20 = vpop.f32.mrf.mxu0  ;;  %v372_v22 = vpop.f32.mrf.mxu1 }
  0xe7   : > { %v411_v24 = vadd.f32 %v567_v14, %v396_v16  ;;  %v415_v25 = vadd.f32 %v567_v14, %v400_v18  ;;  %v394_v26 = vmul.f32 %v566_v8, %v356_v20  ;;  %v398_v27 = vmul.f32 %v566_v8, %v372_v22 }
  0xe8   : > { %v612_v28 = vpop.f32.mrf.mxu0  ;;  %v616_v30 = vpop.f32.mrf.mxu1 }
  0xe9   : > { %v435_v32 = vadd.f32 %v580_v17, %v411_v24  ;;  %v439_v33 = vadd.f32 %v588_v19, %v415_v25  ;;  %v409_v34 = vadd.f32 %v567_v14, %v394_v26  ;;  %v413_v35 = vadd.f32 %v567_v14, %v398_v27 }
  0xea   : > { %v397_v36 = vmul.f32 %v612_v28, %v566_v8  ;;  %v401_v37 = vmul.f32 %v616_v30, %v566_v8  ;;  %v359_v38 = vpop.f32.mrf.mxu0  ;;  %v375_v40 = vpop.f32.mrf.mxu1 }
  0xeb   : > { %v443_v42 = vmax.f32 %v435_v32, 0.0  ;;  %v447_v43 = vmax.f32 %v439_v33, 0.0  ;;  %v433_v44 = vadd.f32 %v576_v21, %v409_v34  ;;  %v437_v45 = vadd.f32 %v584_v23, %v413_v35 }
  0xec   : > { %v412_v46 = vadd.f32 %v567_v14, %v397_v36  ;;  %v416_v47 = vadd.f32 %v567_v14, %v401_v37  ;;  %v395_v48 = vmul.f32 %v566_v8, %v359_v38  ;;  %v399_v49 = vmul.f32 %v566_v8, %v375_v40 }
  0xed   : > { %451 = vst [vmem:[%s234_s11 + $0x10] sm:$0xff] %v443_v42  ;;  %455 = vst [vmem:[%s234_s11 + $0x30] sm:$0xff] %v447_v43  ;;  %v441_v50 = vmax.f32 %v433_v44, 0.0  ;;  %v445_v51 = vmax.f32 %v437_v45, 0.0 }
  0xee   : > { %v436_v52 = vadd.f32 %v581_v29, %v412_v46  ;;  %v440_v53 = vadd.f32 %v589_v31, %v416_v47  ;;  %v410_v54 = vadd.f32 %v567_v14, %v395_v48  ;;  %v414_v55 = vadd.f32 %v567_v14, %v399_v49 }
  0xef   : > { %449 = vst [vmem:[%s234_s11] sm:$0xff] %v441_v50  ;;  %453 = vst [vmem:[%s234_s11 + $0x20] sm:$0xff] %v445_v51 }
  0xf0   : > { %v444_v56 = vmax.f32 %v436_v52, 0.0  ;;  %v448_v57 = vmax.f32 %v440_v53, 0.0  ;;  %v434_v58 = vadd.f32 %v577_v39, %v410_v54  ;;  %v438_v59 = vadd.f32 %v585_v41, %v414_v55 }
  0xf2   : > { %452 = vst [vmem:[%s234_s11 + $0x18] sm:$0xff] %v444_v56  ;;  %456 = vst [vmem:[%s234_s11 + $0x38] sm:$0xff] %v448_v57  ;;  %v442_v60 = vmax.f32 %v434_v58, 0.0  ;;  %v446_v61 = vmax.f32 %v438_v59, 0.0 }
  0xf4   : > { %450 = vst [vmem:[%s234_s11 + $0x8] sm:$0xff] %v442_v60  ;;  %454 = vst [vmem:[%s234_s11 + $0x28] sm:$0xff] %v446_v61 }
  0xf5   : > { %687 = shalt.err (!%p684_p3)
}
  0xf6   : > { %s688_s30 = scalar_lea.hbm %s853_s16, 1024  ;;  %s692_s8 = scalar_lea.hbm %s904_s5, 8192 }
  0xf7   : > { %p689_p4 = scmp.ne.s32.totalorder %s853_s16, %s688_s30  ;;  %p693_p9 = scmp.lt.s32.totalorder %s853_s16, %s904_s5 }
  0xf8   : > { %p694_p10 = scmp.lt.s32.totalorder %s692_s8, %s688_s30 }
  0xf9   : > { %p690_p7 = pnand %p689_p4, %p807_p5 }
  0xfa   : > { %p695_p11 = por %p694_p10, %p693_p9 }
  0xfb   : > { %p691_p8 = pneg %p690_p7 }
  0xfd   : > { %p696_p12 = pnand %p695_p11, %p691_p8 }
  0xff   : > { %699 = shalt.err (!%p696_p12)
}
 0x100   : > { %s737_s11 = smov 128   ;;  %s738_s12 = smov 8  }
 0x101   : > { %625 = dma.vmem_to_hbm [thread:$0]  (%p807_p5), %s855_s13, 1024, %s853_s16, %s859_s22, %s737_s11, %s737_s11, %s738_s12  }
 0x102 PF: > { %p631_p13 = scmp.ge.s32.totalorder %s734_s21, 2  ;;  %s486_s14 = sand.u32 1, %s722_s18  }
 0x103   : > { %s487_s15 = scalar_lea.sflag [#allocation3], %s486_s14 }
 0x104   : > { %p628_p0 = pnand %p631_p13, %p811_p6 }
 0x106   : > { %p629_p1 = pneg %p628_p0 }
 0x108   : > { %717 = dma.done.wait (%p629_p1), %s487_s15, 1024  }
 0x109   : > { %719 = vsyncadd (%p629_p1), %s487_s15, 4294966272  ;;  %p15_p2 = scmp.ge.s32.totalorder %s794_s24, 10   ;;  %s907_s18 = smov %s726_s19 }
 0x10a   : > { %s908_s19 = smov %s730_s20  ;;  %s909_s20 = smov %s805_s27 }
 0x10b   : > { %s910_s21 = smov %s794_s24  ;;  %17 = sbr.rel (!%p15_p2) target bundleno = 3 (0x3), region = 78 }
 0x110   :  { %492 = vsyncpa [#allocation3], 1 }
 0x111   :  { %494 = vsyncpa [#allocation3 + $0x1], 1 }

// kernel: bottleneck_forward.4
= control target key start
LH: loop header
LB: loop body
LE: loop exit
PB: predicated region body
PF: predicated region fallthrough
CT: control target
= control target key end

     0   :  { %s1389_s15 = smov 0   ;;  %s1391_s16 = smov 0   ;;  %s1687_s0 = inlined_call_operand.vmem [shape: bf16[2,1,18,18,64], index: 0, kind: input, shape index: {}]   ;;  %s1688_s1 = inlined_call_operand.vmem [shape: bf16[576,64], index: 1, kind: input, shape index: {}]   ;;  %s1689_s2 = inlined_call_operand.vmem [shape: f32[1,64], index: 2, kind: input, shape index: {}]   ;;  %s1690_s3 = inlined_call_operand.vmem [shape: f32[1,64], index: 3, kind: input, shape index: {}]   ;;  %s1691_s4 = inlined_call_operand.vmem [shape: bf16[2,16,16,64], index: 4, kind: output, shape index: {}]  }
   0x1   :  { %s1393_s17 = smov 0   ;;  %s1395_s18 = smov 0  }
   0x2   :  { %s1397_s19 = smov 0  }
   0x3 LB: > { %s23_s20 = sadd.s32 1, %s1353_s17  ;;  %s26_s21 = sadd.s32 1, %s1357_s18  ;;  %s1361_s19 = sphi %s1397_s19, %s14_s19   ;;  %s1357_s18 = sphi %s1395_s18, %s1695_s18   ;;  %s1353_s17 = sphi %s1393_s17, %s1694_s17   ;;  %s1349_s16 = sphi %s1391_s16, %s1693_s16   ;;  %s1345_s15 = sphi %s1389_s15, %s1692_s15  }
   0x4   : > { %p24_p0 = scmp.ge.s32.totalorder %s23_s20, 8  ;;  %p1055_p1 = scmp.ge.s32.totalorder %s1361_s19, 1 }
   0x5   : > { %p176_p2 = scmp.lt.s32.totalorder %s1361_s19, 17 }
   0x6   : > { %s1697_s20 = smov (%p24_p0, %s23_s20), 0  ;;  %s1699_s21 = smov (!%p24_p0, %s26_s21), %s1357_s18 }
   0x7   : > { %p177_p3 = pnand %p1055_p1, %p176_p2  ;;  %p28_p4 = scmp.ge.s32.totalorder %s1699_s21, 2 }
   0x8   : > { %p207_p5 = scmp.lt.s32.totalorder (!%p177_p3), %s1349_s16, 1  ;;  %s1148_s24 = smul.u32 (!%p177_p3), 24, %s1345_s15 }
   0x9   : > { %s1701_s21 = smov (%p28_p4, %s1699_s21), 0  ;;  %180 = sbr.rel (%p177_p3) target bundleno = 373 (0x175), region = 36 }
   0xa   : > { %s1363_s25 = smov (!%p177_p3), 64   ;;  %s1057_s28 = sshll.u32 (!%p177_p3), %s1345_s15, 1 }
   0xb   : > { %p215_p6 = scmp.lt.s32.totalorder (!%p177_p3), %s1057_s28, 15 }
   0xe   : > { %v1283_v0 = vld [vmem:[%s1688_s1 + $0x78] sm:$0xff]   ;;  %s1703_s16 = smov (!%p207_p5, %s1349_s16), 1  ;;  %v1285_v2 = vld [vmem:[%s1688_s1 + $0x70] sm:$0xff]   ;;  %vm276_vm0 = vsmask.f32 7424  ;;  %v1289_v6 = vld [vmem:[%s1688_s1 + $0x68] sm:$0xff]  }
   0xf   : > { %v1284_v1 = vld [vmem:[%s1688_s1 + $0x38] sm:$0xff]   ;;  %1153 = vmatprep.subr.bf16.mxu0 %v1283_v0  ;;  %s1227_s29 = smul.u32 216, %s1703_s16  ;;  %v1286_v3 = vld [vmem:[%s1688_s1 + $0x30] sm:$0xff]   ;;  %vm311_vm1 = vcmask 1046528   ;;  %v1290_v16 = vld [vmem:[%s1688_s1 + $0x28] sm:$0xff]   ;;  %vm434_vm2 = vcmask 523264  }
  0x10   : > { %1154 = vmatpush3.bf16.msra.mxu0 %v1284_v1  ;;  %v1287_v4 = vld [vmem:[%s1688_s1 + $0xf8] sm:$0xff]   ;;  %v1291_v37 = vld [vmem:[%s1688_s1 + $0xf0] sm:$0xff]   ;;  %v1293_v45 = vld [vmem:[%s1688_s1 + $0x60] sm:$0xff]   ;;  %s1705_s28 = smov (!%p215_p6, %s1057_s28), 15  ;;  %s1059_s30 = sshll.u32 %s1703_s16, 5  ;;  %vm946_vm3 = vcmask 519168  }
  0x11   : > { %1155 = vmatprep.subr.bf16.mxu0 %v1285_v2  ;;  %s211_s10 = scalar_lea.vmem %s1687_s0, %s1227_s29  ;;  %v1288_v5 = vld [vmem:[%s1688_s1 + $0xb8] sm:$0xff]   ;;  %1181 = vmatprep.subr.bf16.mxu1 %v1287_v4  ;;  %v1292_v42 = vld [vmem:[%s1688_s1 + $0xb0] sm:$0xff]   ;;  %v1294_v51 = vld [vmem:[%s1688_s1 + $0x20] sm:$0xff]   ;;  %s1058_s29 = sshll.u32 %s1705_s28, 1 }
  0x12   : > { %s1446_s13 = scalar_lea.vmem %s211_s10, %s1148_s24  ;;  %1182 = vmatpush3.bf16.msra.mxu1 %v1288_v5  ;;  %v1295_v61 = vld [vmem:[%s1688_s1 + $0xe8] sm:$0xff]   ;;  %s219_s6 = sadd.s32 %s1059_s30, %s1058_s29 }
  0x13   : > { %v1066_v7 = vld [vmem:[%s1446_s13 + $0xc] sm:$0xf]  ;;  %v1067_v8 = vld [vmem:[%s1446_s13 + $0x10] sm:$0xf]  ;;  %v1076_v11 = vld [vmem:[%s1446_s13 + $0x18] sm:$0xf]  ;;  %1183 = vmatprep.subr.bf16.mxu1 %v1291_v37 }
  0x14   : > { %1156 = vmatpush3.bf16.msra.mxu0 %v1286_v3  ;;  %v1072_v9 = vld [vmem:[%s1446_s13 + $0xc] sm:$0xe]  ;;  %v1454_v10 = vcombine.low %v1066_v7, %v1067_v8  ;;  %v1458_v12 = vld [vmem:[%s1446_s13 + $0x1c] sm:$0xf]  ;;  %v228_v15 = vld [vmem:[%s1446_s13] sm:$0xf] }
  0x15   : > { %1157 = vmatprep.subr.bf16.mxu0 %v1289_v6  ;;  %v1461_v13 = vcombine.low %v1076_v11, %v1458_v12  ;;  %v1464_v14 = vld [vmem:[%s1446_s13 + $0x20] ss:$0 sps:$4 sm:$0x11]   ;;  %v1094_v17 = vcombine.low %v1072_v9, %v1067_v8  ;;  %v1475_v20 = vld [vmem:[%s1446_s13 + $0x4] sm:$0xf]  ;;  %v1296_v1 = vld [vmem:[%s1688_s1 + $0xa8] sm:$0xff]  }
  0x16   : > { %328 = vrot.lane.b32.xlu0 %v1454_v10, %s1363_s25  ;;  %v339_v18 = vshrl.u32 %v1454_v10, 16  ;;  %v341_v19 = vshll.u32 %v1454_v10, 16  ;;  %v402_v23 = vshll.u32 %v1464_v14, 16  ;;  %v1481_v24 = vcombine.low %v228_v15, %v1475_v20  ;;  %v1484_v25 = vld [vmem:[%s1446_s13 + $0x8] ss:$0 sps:$4 sm:$0x11]   ;;  %1184 = vmatpush3.bf16.msra.mxu1 %v1292_v42 }
  0x17   : > { %v395_v21 = vshrl.u32 %v1461_v13, 16  ;;  %v397_v22 = vshll.u32 %v1461_v13, 16  ;;  %v1489_v27 = vld [vmem:[%s1446_s13 + $0x14] ss:$0 sps:$4 sm:$0x11]   ;;  %v285_v33 = vshll.u32 %v1484_v25, 16  ;;  %1185 = vmatprep.subr.bf16.mxu1 %v1295_v61 }
  0x18   : > { %1158 = vmatpush3.bf16.msra.mxu0 %v1290_v16  ;;  %v1486_v26 = vrot.slane %v341_v19, 1  ;;  %v404_v29 = vrot.slane %v402_v23, 1  ;;  %v278_v30 = vshrl.u32 %v1481_v24, 16  ;;  %v280_v31 = vshll.u32 %v1481_v24, 16  ;;  %v1068_v32 = vld [vmem:[%s1446_s13 + $0x18] sm:$0xf] }
  0x19   : > { %v399_v28 = vrot.slane %v397_v22, 1  ;;  %v368_v34 = vrot.slane %v1094_v17, 1  ;;  %v369_v35 = vrot.slane %v1489_v27, 1  ;;  %v1069_v36 = vld [vmem:[%s1446_s13 + $0x1c] sm:$0xf]  ;;  %v287_v43 = vrot.slane %v285_v33, 1  ;;  %1159 = vmatprep.subr.bf16.mxu0 %v1293_v45 }
  0x1a   : > { %v282_v39 = vrot.slane %v280_v31, 1  ;;  %v1073_v40 = vld [vmem:[%s1446_s13 + $0x18] sm:$0xe]  ;;  %v230_v41 = vld [vmem:[%s1446_s13 + $0xc] sm:$0xf]  ;;  %v1091_v48 = vcombine.low %v1068_v32, %v1069_v36  ;;  %1186 = vmatpush3.bf16.msra.mxu1 %v1296_v1  ;;  %v1300_v31 = vld [vmem:[%s1688_s1 + $0xa0] sm:$0xff]   ;;  %v344_v32 = vor.u32 %v1486_v26, %v339_v18 }
  0x1b   : > { %v400_v38 = vor.u32 %v399_v28, %v395_v21  ;;  %v1506_v44 = vld [vmem:[%s1446_s13 + $0x10] sm:$0xf]  ;;  %v1095_v49 = vcombine.low %v1073_v40, %v1069_v36  ;;  %v1513_v50 = vld [vmem:[%s1446_s13 + $0x14] ss:$0 sps:$4 sm:$0x11]   ;;  %v370_v52 = vsel %vm311_vm1, %v368_v34, %v369_v35  ;;  %v1297_v9 = vld [vmem:[%s1688_s1 + $0x58] sm:$0xff]  }
  0x1c   : > { %v283_v47 = vor.u32 %v282_v39, %v278_v30  ;;  %v1521_v53 = vcombine.low %v230_v41, %v1506_v44  ;;  %v1078_v54 = vld [vmem:[%s1446_s13 + $0x24] sm:$0xf]  ;;  %v1525_v55 = vld [vmem:[%s1446_s13 + $0x28] sm:$0xf]  ;;  %v351_v57 = vshrl.u32 %v1091_v48, 16  ;;  %v297_v58 = vshll.u32 %v1513_v50, 16  ;;  %1160 = vmatpush3.bf16.msra.mxu0 %v1294_v51 }
  0x1d   : > { %v405_v46 = vsel %vm276_vm0, %v400_v38, %v404_v29  ;;  %v1530_v59 = vcombine.low %v1078_v54, %v1525_v55  ;;  %v1533_v60 = vld [vmem:[%s1446_s13 + $0x2c] ss:$0 sps:$4 sm:$0x11]   ;;  %v353_v62 = vshll.u32 %v1091_v48, 16  ;;  %v371_v5 = vrot.slane %v1095_v49, 1  ;;  %1161 = vmatprep.subr.bf16.mxu0 %v1297_v9  ;;  %v1298_v19 = vld [vmem:[%s1688_s1 + $0x18] sm:$0xff]  }
  0x1e   : > { %418 = vrot.lane.b32.xlu1 %v405_v46, %s1363_s25  ;;  %v288_v56 = vsel %vm276_vm0, %v283_v47, %v287_v43  ;;  %v290_v63 = vshrl.u32 %v1521_v53, 16  ;;  %v292_v0 = vshll.u32 %v1521_v53, 16  ;;  %v414_v4 = vshll.u32 %v1533_v60, 16  ;;  %v1282_v8 = vld [vmem:[%s1446_s13 + $0x20] ss:$0 sps:$4 sm:$0x11]  }
  0x1f   : > { %301 = vrot.lane.b32.xlu0 %v288_v56, %s1363_s25  ;;  %v407_v2 = vshrl.u32 %v1530_v59, 16  ;;  %v409_v3 = vshll.u32 %v1530_v59, 16  ;;  %v299_v7 = vrot.slane %v297_v58, 1  ;;  %v372_v17 = vrot.slane %v1282_v8, 1  ;;  %v1299_v30 = vld [vmem:[%s1688_s1 + $0xe0] sm:$0xff]   ;;  %v1301_v34 = vld [vmem:[%s1688_s1 + $0x50] sm:$0xff]  }
  0x20   : > { %v294_v6 = vrot.slane %v292_v0, 1  ;;  %v416_v15 = vrot.slane %v414_v4, 1  ;;  %1162 = vmatpush3.bf16.msra.mxu0 %v1298_v19  ;;  %v355_v29 = vrot.slane %v353_v62, 1  ;;  %v346_v33 = vshll.u32 %v1489_v27, 16  ;;  %1187 = vmatprep.subr.bf16.mxu1 %v1299_v30  ;;  %v1302_v35 = vld [vmem:[%s1688_s1 + $0x10] sm:$0xff]   ;;  %v1303_v10 = vld [vmem:[%s1688_s1 + $0xd8] sm:$0xff]  }
  0x21   : > { %v411_v11 = vrot.slane %v409_v3, 1  ;;  %v373_v28 = vsel %vm311_vm1, %v371_v5, %v372_v17  ;;  %1188 = vmatpush3.bf16.msra.mxu1 %v1300_v31  ;;  %1163 = vmatprep.subr.bf16.mxu0 %v1301_v34  ;;  %v358_v26 = vshll.u32 %v1282_v8, 16  ;;  %v1304_v27 = vld [vmem:[%s1688_s1 + $0x98] sm:$0xff]   ;;  %v1305_v38 = vld [vmem:[%s1688_s1 + $0x48] sm:$0xff]   ;;  %v1307_v41 = vld [vmem:[%s1688_s1 + $0xd0] sm:$0xff]   ;;  %v313_v49 = vrot.slane %v1484_v25, 1 }
  0x22   : > { %374 = vrot.lane.b32.xlu1 %v370_v52, %s1363_s25  ;;  %v295_v16 = vor.u32 %v294_v6, %v290_v63  ;;  %v348_v36 = vrot.slane %v346_v33, 1  ;;  %v356_v18 = vor.u32 %v355_v29, %v351_v57  ;;  %1189 = vmatprep.subr.bf16.mxu1 %v1303_v10  ;;  %v1306_v40 = vld [vmem:[%s1688_s1 + $0x8] sm:$0xff]   ;;  %v1308_v43 = vld [vmem:[%s1688_s1 + $0x90] sm:$0xff]   ;;  %v1309_v45 = vld [vmem:[%s1688_s1 + $0x40] sm:$0xff]   ;;  %v316_v62 = vrot.slane %v1513_v50, 1  ;;  %s1060_s16 = sshll.u32 %s219_s6, 2 }
  0x23   : > { %330 = vrot.lane.b32.xlu0 %v1091_v48, %s1363_s25  ;;  %v412_v21 = vor.u32 %v411_v11, %v407_v2  ;;  %v360_v39 = vrot.slane %v358_v26, 1  ;;  %v1310_v46 = vld [vmem:[%s1688_s1] sm:$0xff]   ;;  %v1312_v51 = vld [vmem:[%s1688_s1 + $0xc8] sm:$0xff]   ;;  %v1314_v56 = vld [vmem:[%s1688_s1 + $0x118] sm:$0xff]   ;;  %v429_v2 = vrot.slane %v1464_v14, 1  ;;  %v432_v4 = vrot.slane %v1533_v60, 1  ;;  %s221_s10 = scalar_lea.vmem %s1691_s4, %s1060_s16 }
  0x24   : > { %v300_v22 = vsel %vm276_vm0, %v295_v16, %v299_v7  ;;  %1164 = vmatpush3.bf16.msra.mxu0 %v1302_v35  ;;  %v349_v37 = vsel %vm276_vm0, %v344_v32, %v348_v36  ;;  %v234_v47 = vld [vmem:[%s1446_s13] sm:$0xe]  ;;  %v1313_v52 = vld [vmem:[%s1688_s1 + $0x88] sm:$0xff]   ;;  %v1082_v63 = vld [vmem:[%s1446_s13 + $0x18] sm:$0xe] }
  0x25   : > { %v417_v23 = vsel %vm276_vm0, %v412_v21, %v416_v15  ;;  %1190 = vmatpush3.bf16.msra.mxu1 %v1304_v27  ;;  %1165 = vmatprep.subr.bf16.mxu0 %v1305_v38  ;;  %v1595_v42 = vsel %vm276_vm0, %v356_v18, %v360_v39  ;;  %v1088_v48 = vcombine.low %v234_v47, %v1475_v20  ;;  %v1315_v20 = vld [vmem:[%s1688_s1 + $0xc0] sm:$0xff]   ;;  %v235_v58 = vld [vmem:[%s1446_s13 + $0xc] sm:$0xe] }
  0x26   : > { %303 = vrot.lane.b32.xlu1 %v300_v22, %s1363_s25  ;;  %1191 = vmatprep.subr.bf16.mxu1 %v1307_v41  ;;  %v1316_v57 = vld [vmem:[%s1688_s1 + $0x80] sm:$0xff]   ;;  %v1089_v61 = vcombine.low %v235_v58, %v1506_v44  ;;  %v1100_v1 = vcombine.low %v1082_v63, %v1458_v12 }
  0x27   : > { %420 = vrot.lane.b32.xlu0 %v417_v23, %s1363_s25  ;;  %v312_v54 = vrot.slane %v1088_v48, 1  ;;  %v1083_v3 = vld [vmem:[%s1446_s13 + $0x24] sm:$0xe]  ;;  %v1141_v58 = vld [vmem:[%s1690_s3] ss:$0 sm:$0xff] }
  0x28   : > { %1166 = vmatpush3.bf16.msra.mxu0 %v1306_v40  ;;  %v315_v0 = vrot.slane %v1089_v61, 1  ;;  %v1101_v5 = vcombine.low %v1083_v3, %v1525_v55  ;;  %v428_v7 = vrot.slane %v1100_v1, 1  ;;  %v1317_v55 = vld [vmem:[%s1688_s1 + $0x110] sm:$0xff]  }
  0x29   : > { %1192 = vmatpush3.bf16.msra.mxu1 %v1308_v43  ;;  %1167 = vmatprep.subr.bf16.mxu0 %v1309_v45  ;;  %v314_v25 = vsel %vm311_vm1, %v312_v54, %v313_v49  ;;  %v1140_v49 = vld [vmem:[%s1689_s2] ss:$0 sm:$0xff] }
  0x2a   : > { %376 = vrot.lane.b32.xlu1 %v373_v28, %s1363_s25  ;;  %1193 = vmatprep.subr.bf16.mxu1 %v1312_v51  ;;  %v317_v6 = vsel %vm311_vm1, %v315_v0, %v316_v62  ;;  %v431_v8 = vrot.slane %v1101_v5, 1  ;;  %v430_v44 = vsel %vm311_vm1, %v428_v7, %v429_v2  ;;  %v1320_v28 = vld [vmem:[%s1688_s1 + $0x100] sm:$0xff]  }
  0x2c   : > { %1168 = vmatpush3.bf16.msra.mxu0 %v1310_v46  ;;  %v433_v50 = vsel %vm311_vm1, %v431_v8, %v432_v4 }
  0x2d   : > { %1194 = vmatpush3.bf16.msra.mxu1 %v1313_v52  ;;  %1215 = vmatprep.subr.bf16.mxu0 %v1314_v56 }
  0x2e   : > { %1195 = vmatprep.subr.bf16.mxu1 %v1315_v20 }
  0x31   : > { %1196 = vmatpush3.bf16.msra.mxu1 %v1316_v57 }
  0x88   : > { %v329_v9 = vpop.permute.xlu0 %328 }
  0x89   : > { %v443_v11 = vsel %vm434_vm2, %v314_v25, %v329_v9 }
  0x8a   : > { %789 = vmatprep.mubr.bf16.mxu0 %v443_v11 }
  0x90   : > { %v419_v12 = vpop.permute.xlu1 %418 }
  0x91   : > { %v458_v14 = vsel %vm434_vm2, %v1461_v13, %v419_v12  ;;  %v302_v60 = vpop.permute.xlu0 %301  ;;  %v1319_v13 = vld [vmem:[%s1688_s1 + $0x108] sm:$0xff]  }
  0x92   : > { %838 = vmatprep.mubr.bf16.mxu1 %v458_v14  ;;  %v436_v15 = vsel %vm434_vm2, %v1481_v24, %v302_v60 }
  0x93   : > { %790 = vmatmul.mubr.bf16.vlgmr.msra.gmra.mxu0 %v436_v15 }
  0x94   : > { %v375_v16 = vpop.permute.xlu1 %374  ;;  %1216 = vmatpush3.bf16.msra.mxu0 %v1314_v56 }
  0x95   : > { %v451_v17 = vsel %vm434_vm2, %v349_v37, %v375_v16  ;;  %1217 = vmatprep.subr.bf16.mxu0 %v1317_v55  ;;  %v331_v19 = vpop.permute.xlu0 %330 }
  0x96   : > { %839 = vmatmul.mubr.bf16.vlgmr.msra.gmra.mxu1 %v451_v17  ;;  %v447_v21 = vsel %vm434_vm2, %v317_v6, %v331_v19 }
  0x97   : > { %797 = vmatprep.mubr.bf16.mxu0 %v447_v21 }
  0x98   : > { %1218 = vmatpush3.bf16.msra.mxu0 %v1317_v55  ;;  %v304_v22 = vpop.permute.xlu1 %303 }
  0x99   : > { %1219 = vmatprep.subr.bf16.mxu0 %v1319_v13  ;;  %v439_v24 = vsel %vm434_vm2, %v1521_v53, %v304_v22  ;;  %v421_v23 = vpop.permute.xlu0 %420 }
  0x9a   : > { %v461_v29 = vsel %vm434_vm2, %v1530_v59, %v421_v23 }
  0x9b   : > { %798 = vmatmul.mubr.bf16.gmra.mxu0 %v439_v24  ;;  %846 = vmatprep.mubr.bf16.mxu1 %v461_v29 }
  0x9c   : > { %1220 = vmatpush3.bf16.msra.mxu0 %v1319_v13  ;;  %v377_v30 = vpop.permute.xlu1 %376  ;;  %1223 = vmatprep.mubr.msk.bf16.mxu0 %vm434_vm2, %v430_v44 }
  0x9d   : > { %1221 = vmatprep.subr.bf16.mxu0 %v1320_v28  ;;  %v455_v31 = vsel %vm434_vm2, %v1595_v42, %v377_v30 }
  0x9e   : > { %847 = vmatmul.mubr.bf16.gmra.mxu1 %v455_v31 }
  0xa0   : > { %1222 = vmatpush3.bf16.msra.mxu0 %v1320_v28 }
  0xa3   : > { %1224 = vmatmul.mubr.msk.bf16.vlgmr.msra.gmra.mxu0 %vm434_vm2, %v433_v50 }
 0x153   : > { %v1169_v53 = vpop.f32.mrf.mxu0 }
 0x155   : > { %v1170_v32 = vpop.f32.mrf.mxu0 }
 0x156   : > { %v1197_v33 = vpop.f32.mrf.mxu1  ;;  %v1171_v43 = vadd.f32 %v1170_v32, %v1169_v53 }
 0x157   : > { %v1172_v34 = vpop.f32.mrf.mxu0 }
 0x158   : > { %v1198_v59 = vpop.f32.mrf.mxu1 }
 0x159   : > { %v1173_v35 = vpop.f32.mrf.mxu0  ;;  %v1199_v38 = vadd.f32 %v1198_v59, %v1197_v33 }
 0x15a   : > { %v1200_v36 = vpop.f32.mrf.mxu1  ;;  %v1174_v57 = vadd.f32 %v1173_v35, %v1172_v34 }
 0x15b   : > { %v1175_v10 = vpop.f32.mrf.mxu0  ;;  %v841_v52 = vadd.f32 %v1199_v38, %v1171_v43 }
 0x15c   : > { %v1201_v18 = vpop.f32.mrf.mxu1 }
 0x15d   : > { %v1176_v26 = vpop.f32.mrf.mxu0  ;;  %v1202_v48 = vadd.f32 %v1201_v18, %v1200_v36 }
 0x15e   : > { %v1203_v27 = vpop.f32.mrf.mxu1  ;;  %v1177_v40 = vadd.f32 %v1176_v26, %v1175_v10 }
 0x15f   : > { %v1178_v37 = vpop.f32.mrf.mxu0  ;;  %v844_v2 = vadd.f32 %v1202_v48, %v1174_v57 }
 0x160   : > { %v1204_v39 = vpop.f32.mrf.mxu1 }
 0x161   : > { %v1179_v41 = vpop.f32.mrf.mxu0  ;;  %v1205_v42 = vadd.f32 %v1204_v39, %v1203_v27 }
 0x162   : > { %v1206_v45 = vpop.f32.mrf.mxu1  ;;  %v1180_v54 = vadd.f32 %v1179_v41, %v1178_v37 }
 0x163   : > { %v849_v46 = vadd.f32 %v1205_v42, %v1177_v40  ;;  %v1225_v47 = vpop.f32.mrf.mxu0 }
 0x164   : > { %v1207_v51 = vpop.f32.mrf.mxu1 }
 0x165   : > { %v898_v56 = vadd.f32 %v1225_v47, %v849_v46  ;;  %v1208_v20 = vadd.f32 %v1207_v51, %v1206_v45  ;;  %v889_v25 = vpop.f32.mrf.mxu0 }
 0x166   : > { %v890_v61 = vadd.f32 %v889_v25, %v841_v52 }
 0x167   : > { %v913_v62 = vmul.f32 %v1140_v49, %v898_v56  ;;  %v852_v63 = vadd.f32 %v1208_v20, %v1180_v54  ;;  %v1226_v0 = vpop.f32.mrf.mxu0 }
 0x168   : > { %v911_v1 = vmul.f32 %v1140_v49, %v890_v61 }
 0x169   : > { %v924_v3 = vadd.f32 %v1141_v58, %v913_v62  ;;  %v901_v4 = vadd.f32 %v1226_v0, %v852_v63  ;;  %v892_v5 = vpop.f32.mrf.mxu0 }
 0x16a   : > { %v922_v6 = vadd.f32 %v1141_v58, %v911_v1  ;;  %v893_v7 = vadd.f32 %v892_v5, %v844_v2 }
 0x16b   : > { %v928_v8 = vmax.f32 %v924_v3, 0.0  ;;  %v914_v44 = vmul.f32 %v1140_v49, %v901_v4 }
 0x16c   : > { %v926_v50 = vmax.f32 %v922_v6, 0.0  ;;  %v912_v9 = vmul.f32 %v1140_v49, %v893_v7 }
 0x16d   : > { %v1151_v11 = vpack.c.bf16 %v928_v8, %v928_v8  ;;  %v925_v12 = vadd.f32 %v1141_v58, %v914_v44 }
 0x16e   : > { %v1149_v14 = vpack.c.bf16 %v926_v50, %v926_v50  ;;  %v923_v60 = vadd.f32 %v1141_v58, %v912_v9 }
 0x16f   : > { %949 = vst.msk [vmem:[%s221_s10 + $0x8] sm:$0xf] %vm946_vm3, %v1151_v11  ;;  %v929_v55 = vmax.f32 %v925_v12, 0.0 }
 0x170   : > { %947 = vst.msk [vmem:[%s221_s10] sm:$0xf] %vm946_vm3, %v1149_v14  ;;  %v927_v15 = vmax.f32 %v923_v60, 0.0 }
 0x171   : > { %v1152_v16 = vpack.c.bf16 %v929_v55, %v929_v55 }
 0x172   : > { %v1150_v17 = vpack.c.bf16 %v927_v15, %v927_v15 }
 0x173   : > { %950 = vst.msk [vmem:[%s221_s10 + $0xc] sm:$0xf] %vm946_vm3, %v1152_v16 }
 0x174   : > { %948 = vst.msk [vmem:[%s221_s10 + $0x4] sm:$0xf] %vm946_vm3, %v1150_v17 }
 0x175 PF: > { %s14_s19 = sadd.s32 1, %s1361_s19   ;;  %s1692_s15 = smov %s1353_s17 }
 0x176   : > { %p11_p7 = scmp.ge.s32.totalorder %s14_s19, 18   ;;  %s1693_s16 = smov %s1357_s18 }
 0x177   : > { %s1694_s17 = smov %s1697_s20  ;;  %s1695_s18 = smov %s1701_s21 }
 0x178   :  { %13 = sbr.rel (!%p11_p7) target bundleno = 3 (0x3), region = 69 }

</bundles_post_ra>
